<compile_context>
chip_gen: v6e
topology: v6e:2x2x1
jax: 0.10.0
libtpu: 0.0.40
codegen_flags: <defaults>
</compile_context>

<pallas_src>
import jax
import jax.numpy as jnp
import numpy as np
from jax.experimental import pallas as pl
from jax.experimental.pallas import tpu as pltpu

# ----- configuration (mirrors `args` of SCOAgent) -----
BS = 2              # number of episodes in the batch
N_AGENTS = 4        # args.n_agents
N_ACTIONS = 8       # args.n_actions
HIDDEN = 32         # args.rnn_hidden_dim
INPUT_SHAPE = 16    # per-agent observation/input size
B = BS * N_AGENTS   # flat batch dimension seen by the linear layers (= 8)
T_STEPS = 6         # rollout length used by the demo

A = N_ACTIONS
N = N_AGENTS
HEADS_W = N_ACTIONS + 1 + N_AGENTS * N_ACTIONS + N_AGENTS * N_ACTIONS   # 8+1+32+32 = 73
LANES = 128


def _build_kernel(T):
    """Kernel closure: T (static) timesteps, fully unrolled in the body."""
    H = HIDDEN

    def kernel(x_ref, h0_ref, w1_ref, b1_ref, wgx_ref, wgh_ref, bg_ref,
               wh_ref, bh_ref, gsum_ref, bsum_ref, colsel_ref, fold_ref, out_ref):
        f32 = jnp.float32

        # ---- hoisted x-only work (off the serial chain, all T steps at once) ----
        x1 = jnp.maximum(
            jnp.dot(x_ref[...], w1_ref[...], preferred_element_type=f32) + b1_ref[...],
            0.0)                                                          # (T*B, H)
        # gx columns: [x@wih_rz + (bih+bhh)_rz | x@wih_n + bih_n | bhh_n]
        gx = jnp.dot(x1, wgx_ref[...], preferred_element_type=f32) + bg_ref[...]   # (T*B, 4H)

        wgh = wgh_ref[...]        # (H, 4H)   [whh_rz | 0 | whh_n]
        wh = wh_ref[...]          # (H, 128)  fused heads, zero-padded lanes 73:128
        bh = bh_ref[...]          # (1, 128)
        gsum = gsum_ref[...]      # (N*A, N*A) per-group sum matrix
        bsum = bsum_ref[...]      # (B, B)     per-episode sum matrix
        colsel = colsel_ref[...]  # (B, N*A)   row b*N+j selects lane group j
        fold = fold_ref[...]      # (N*A, A)   fold groups onto A lanes
        zpad = jnp.zeros((B, LANES - A - H), f32)

        h = h0_ref[...]           # (B, H) carried hidden state
        for t in range(T):        # fully unrolled; only h-dependent work per step
            # ---- GRUCell (PyTorch semantics; x-half already in gx) ----
            g = gx[t * B:(t + 1) * B, :] + jnp.dot(h, wgh, preferred_element_type=f32)
            rz = jax.nn.sigmoid(g[:, 0:2 * H])            # one sigmoid for r and z
            r = rz[:, 0:H]
            z = rz[:, H:2 * H]
            n = jnp.tanh(g[:, 2 * H:3 * H] + r * g[:, 3 * H:4 * H])
            h = (1.0 - z) * n + z * h                     # (B, H)

            # ---- fused heads: [q | key | agent_weights (expanded N*A) | action_weights] ----
            heads = jnp.dot(h, wh, preferred_element_type=f32) + bh      # (B, 128)
            q = heads[:, 0:A]                                            # (B, A)
            x_key = heads[:, A:A + 1]                                    # (B, 1)
            aw = jax.nn.sigmoid(heads[:, A + 1:A + 1 + N * A])           # (B, N*A)
            acw = heads[:, A + 1 + N * A:A + 1 + 2 * N * A]              # (B, N*A) logits

            # grouped softmax: a single row-wide max shift cancels per group;
            # group sums via one constant 0/1 matmul; divide on the EUP.
            e = jnp.exp(acw - jnp.max(acw, axis=-1, keepdims=True))
            ssum = jnp.maximum(jnp.dot(e, gsum, preferred_element_type=f32), 1e-30)
            inv = pl.reciprocal(ssum, approx=True)
            weighted = (x_key * aw) * (e * inv)                          # (B, N*A)

            # sum over source agents within each episode, then pick own lane group
            summed = jnp.dot(bsum, weighted, preferred_element_type=f32)       # (B, N*A)
            x_q = jnp.dot(summed * colsel, fold, preferred_element_type=f32)   # (B, A)

            # ---- lane-dense 128-wide store: [q + x_q | h | zeros] ----
            out_ref[t * B:(t + 1) * B, :] = jnp.concatenate([q + x_q, h, zpad], axis=1)

    return kernel


# ----- operand packing: natural-shape weights, zero-padded where useful -----
def pack_params(p):
    f32 = jnp.float32
    H = HIDDEN
    zeros_hh = jnp.zeros((H, H), f32)

    # GRU x-side weight (H, 4H): [wih_rz | wih_n | 0]; h-side (H, 4H): [whh_rz | 0 | whh_n]
    wgru_x = jnp.concatenate([p["wih"][:, 0:2 * H], p["wih"][:, 2 * H:3 * H], zeros_hh], axis=1)
    wgru_h = jnp.concatenate([p["whh"][:, 0:2 * H], zeros_hh, p["whh"][:, 2 * H:3 * H]], axis=1)
    b_gru = jnp.concatenate([p["bih"][:, 0:2 * H] + p["bhh"][:, 0:2 * H],
                             p["bih"][:, 2 * H:3 * H],
                             p["bhh"][:, 2 * H:3 * H]], axis=1)          # (1, 4H)

    # fused heads (H, 128): [w2 | wk | waw expanded to N*A cols | wac | zero pad]
    waw_exp = jnp.repeat(p["waw"], N_ACTIONS, axis=1)                    # (H, N*A)
    baw_exp = jnp.repeat(p["baw"], N_ACTIONS, axis=1)                    # (1, N*A)
    w_heads = jnp.zeros((H, LANES), f32).at[:, 0:HEADS_W].set(
        jnp.concatenate([p["w2"], p["wk"], waw_exp, p["wac"]], axis=1))
    b_heads = jnp.zeros((1, LANES), f32).at[:, 0:HEADS_W].set(
        jnp.concatenate([p["b2"], p["bk"], baw_exp, p["bac"]], axis=1))

    # constant 0/1 selection matrices, built once on the host (resident in VMEM)
    r32 = np.arange(N * A)
    rb = np.arange(B)
    gsum = jnp.asarray(r32[:, None] // A == r32[None, :] // A, f32)      # (N*A, N*A)
    bsum = jnp.asarray(rb[:, None] // N == rb[None, :] // N, f32)        # (B, B)
    colsel = jnp.asarray(r32[None, :] // A == rb[:, None] % N, f32)      # (B, N*A)
    fold = jnp.asarray(r32[:, None] % A == np.arange(A)[None, :], f32)   # (N*A, A)

    return {"w1": p["w1"], "b1": p["b1"],
            "wgru_x": wgru_x, "wgru_h": wgru_h, "b_gru": b_gru,
            "w_heads": w_heads, "b_heads": b_heads,
            "gsum": gsum, "bsum": bsum, "colsel": colsel, "fold": fold}


def _full_spec(shape):
    # full-array block, resident across the (trivial) grid
    return pl.BlockSpec(shape, lambda i: (0, 0))


def sco_agent_rollout(packed, inputs_seq, hidden0):
    """inputs_seq: (T, B, INPUT_SHAPE), hidden0: (B, HIDDEN) -> (q (T,B,A), h (T,B,H))."""
    T = inputs_seq.shape[0]
    x_flat = inputs_seq.reshape(T * B, INPUT_SHAPE)
    out = pl.pallas_call(
        _build_kernel(T),
        out_shape=jax.ShapeDtypeStruct((T * B, LANES), jnp.float32),
        grid=(1,),
        in_specs=[
            _full_spec((T * B, INPUT_SHAPE)),        # inputs, all T steps
            _full_spec((B, HIDDEN)),                 # initial hidden state
            _full_spec((INPUT_SHAPE, HIDDEN)),       # fc1 weight
            _full_spec((1, HIDDEN)),                 # fc1 bias
            _full_spec((HIDDEN, 4 * HIDDEN)),        # GRU x-side weight
            _full_spec((HIDDEN, 4 * HIDDEN)),        # GRU h-side weight
            _full_spec((1, 4 * HIDDEN)),             # fused GRU bias
            _full_spec((HIDDEN, LANES)),             # fused heads weight
            _full_spec((1, LANES)),                  # fused heads bias
            _full_spec((N * A, N * A)),              # group-sum matrix
            _full_spec((B, B)),                      # batch-sum matrix
            _full_spec((B, N * A)),                  # column-select mask
            _full_spec((N * A, A)),                  # fold matrix
        ],
        out_specs=_full_spec((T * B, LANES)),
        compiler_params=pltpu.CompilerParams(dimension_semantics=("arbitrary",)),
    )(x_flat, hidden0,
      packed["w1"], packed["b1"],
      packed["wgru_x"], packed["wgru_h"], packed["b_gru"],
      packed["w_heads"], packed["b_heads"],
      packed["gsum"], packed["bsum"], packed["colsel"], packed["fold"])
    out = out.reshape(T, B, LANES)
    return out[:, :, 0:N_ACTIONS], out[:, :, N_ACTIONS:N_ACTIONS + HIDDEN]


def sco_agent_forward(packed, inputs, hidden):
    """Single step — matches SCOAgent.forward(bs, inputs, hidden_state) -> (q, h)."""
    q_seq, h_seq = sco_agent_rollout(packed, inputs[None], hidden)
    return q_seq[0], h_seq[0]


# ----- deterministic parameter init (PyTorch-style uniform(-1/sqrt(fan_in), ...)) -----
def init_params(key):
    def linear(key, fan_in, fan_out):
        kw, kb = jax.random.split(key)
        bound = 1.0 / np.sqrt(fan_in)
        w = jax.random.uniform(kw, (fan_in, fan_out), jnp.float32, -bound, bound)
        b = jax.random.uniform(kb, (1, fan_out), jnp.float32, -bound, bound)
        return w, b

    keys = jax.random.split(key, 8)
    p = {}
    p["w1"], p["b1"] = linear(keys[0], INPUT_SHAPE, HIDDEN)
    bound = 1.0 / np.sqrt(HIDDEN)
    p["wih"] = jax.random.uniform(keys[1], (HIDDEN, 3 * HIDDEN), jnp.float32, -bound, bound)
    p["bih"] = jax.random.uniform(keys[2], (1, 3 * HIDDEN), jnp.float32, -bound, bound)
    p["whh"] = jax.random.uniform(keys[3], (HIDDEN, 3 * HIDDEN), jnp.float32, -bound, bound)
    p["bhh"] = jax.random.uniform(keys[4], (1, 3 * HIDDEN), jnp.float32, -bound, bound)
    p["w2"], p["b2"] = linear(keys[5], HIDDEN, N_ACTIONS)
    p["wk"], p["bk"] = linear(keys[6], HIDDEN, 1)
    kaw, kac = jax.random.split(keys[7])
    p["waw"], p["baw"] = linear(kaw, HIDDEN, N_AGENTS)
    p["wac"], p["bac"] = linear(kac, HIDDEN, N_AGENTS * N_ACTIONS)
    return p


# ----- pure-JAX reference for correctness check -----
def reference_step(params, inputs, hidden):
    H = HIDDEN
    x = jax.nn.relu(inputs @ params["w1"] + params["b1"])
    gi = x @ params["wih"] + params["bih"]
    gh = hidden @ params["whh"] + params["bhh"]
    r = jax.nn.sigmoid(gi[:, :H] + gh[:, :H])
    z = jax.nn.sigmoid(gi[:, H:2 * H] + gh[:, H:2 * H])
    n = jnp.tanh(gi[:, 2 * H:] + r * gh[:, 2 * H:])
    h = (1.0 - z) * n + z * hidden
    q = h @ params["w2"] + params["b2"]
    x_key = (h @ params["wk"] + params["bk"]).reshape(BS, N_AGENTS, 1)
    aw = jax.nn.sigmoid(h @ params["waw"] + params["baw"]).reshape(BS, N_AGENTS, N_AGENTS)
    acw = jax.nn.softmax(
        (h @ params["wac"] + params["bac"]).reshape(BS, N_AGENTS, N_AGENTS, N_ACTIONS), axis=-1)
    x_agent = (x_key * aw)[..., None]                      # (BS, N, N, 1)
    x_q = jnp.sum(x_agent * acw, axis=1)                   # (BS, N, A)
    q = q + x_q.reshape(BS * N_AGENTS, N_ACTIONS)
    return q, h


def reference_rollout(params, inputs_seq, hidden0):
    h = hidden0
    qs, hs = [], []
    for t in range(inputs_seq.shape[0]):
        q, h = reference_step(params, inputs_seq[t], h)
        qs.append(q)
        hs.append(h)
    return jnp.stack(qs), jnp.stack(hs)


if __name__ == "__main__":
    key = jax.random.PRNGKey(0)
    kp, kx, kh = jax.random.split(key, 3)
    params = init_params(kp)
    packed = pack_params(params)
    inputs_seq = jax.random.normal(kx, (T_STEPS, B, INPUT_SHAPE), jnp.float32)
    hidden0 = jax.random.normal(kh, (B, HIDDEN), jnp.float32)

    # multi-step rollout (time loop fully inside one kernel invocation)
    q_seq, h_seq = sco_agent_rollout(packed, inputs_seq, hidden0)
    q_seq = jax.block_until_ready(q_seq)
    h_seq = jax.block_until_ready(h_seq)

    q_ref, h_ref = reference_rollout(params, inputs_seq, hidden0)
    # q tolerance slightly loosened to absorb pl.reciprocal(approx=True) in the softmax
    np.testing.assert_allclose(np.asarray(q_seq), np.asarray(q_ref), atol=2e-3, rtol=2e-3)
    np.testing.assert_allclose(np.asarray(h_seq), np.asarray(h_ref), atol=5e-4, rtol=5e-4)

    # single-step path (original module interface)
    q1, h1 = sco_agent_forward(packed, inputs_seq[0], hidden0)
    q1 = jax.block_until_ready(q1)
    h1 = jax.block_until_ready(h1)
    np.testing.assert_allclose(np.asarray(q1), np.asarray(q_ref[0]), atol=2e-3, rtol=2e-3)
    np.testing.assert_allclose(np.asarray(h1), np.asarray(h_ref[0]), atol=5e-4, rtol=5e-4)

    print("KERNEL_OK")
</pallas_src>

<mosaic_0001>
module attributes {stable_mosaic.version = 11 : i64} {
  func.func @kernel(%arg0: i32, %arg1: memref<48x16xf32, #tpu.memory_space<vmem>>, %arg2: memref<8x32xf32, #tpu.memory_space<vmem>>, %arg3: memref<16x32xf32, #tpu.memory_space<vmem>>, %arg4: memref<1x32xf32, #tpu.memory_space<vmem>>, %arg5: memref<32x128xf32, #tpu.memory_space<vmem>>, %arg6: memref<32x128xf32, #tpu.memory_space<vmem>>, %arg7: memref<1x128xf32, #tpu.memory_space<vmem>>, %arg8: memref<32x128xf32, #tpu.memory_space<vmem>>, %arg9: memref<1x128xf32, #tpu.memory_space<vmem>>, %arg10: memref<32x32xf32, #tpu.memory_space<vmem>>, %arg11: memref<8x8xf32, #tpu.memory_space<vmem>>, %arg12: memref<8x32xf32, #tpu.memory_space<vmem>>, %arg13: memref<32x8xf32, #tpu.memory_space<vmem>>, %arg14: memref<48x128xf32, #tpu.memory_space<vmem>>) attributes {dimension_semantics = [#tpu.dimension_semantics<arbitrary>], iteration_bounds = array<i64: 1>, scalar_prefetch = 0 : i64, scratch_operands = 0 : i64, tpu.core_type = #tpu.core_type<tc>, window_params = [{pipeline_mode = #tpu.pipeline_mode<synchronous>, transform_indices = @transform_0, window_bounds = array<i64: 48, 16>}, {pipeline_mode = #tpu.pipeline_mode<synchronous>, transform_indices = @transform_1, window_bounds = array<i64: 8, 32>}, {pipeline_mode = #tpu.pipeline_mode<synchronous>, transform_indices = @transform_2, window_bounds = array<i64: 16, 32>}, {pipeline_mode = #tpu.pipeline_mode<synchronous>, transform_indices = @transform_3, window_bounds = array<i64: 1, 32>}, {pipeline_mode = #tpu.pipeline_mode<synchronous>, transform_indices = @transform_4, window_bounds = array<i64: 32, 128>}, {pipeline_mode = #tpu.pipeline_mode<synchronous>, transform_indices = @transform_5, window_bounds = array<i64: 32, 128>}, {pipeline_mode = #tpu.pipeline_mode<synchronous>, transform_indices = @transform_6, window_bounds = array<i64: 1, 128>}, {pipeline_mode = #tpu.pipeline_mode<synchronous>, transform_indices = @transform_7, window_bounds = array<i64: 32, 128>}, {pipeline_mode = #tpu.pipeline_mode<synchronous>, transform_indices = @transform_8, window_bounds = array<i64: 1, 128>}, {pipeline_mode = #tpu.pipeline_mode<synchronous>, transform_indices = @transform_9, window_bounds = array<i64: 32, 32>}, {pipeline_mode = #tpu.pipeline_mode<synchronous>, transform_indices = @transform_10, window_bounds = array<i64: 8, 8>}, {pipeline_mode = #tpu.pipeline_mode<synchronous>, transform_indices = @transform_11, window_bounds = array<i64: 8, 32>}, {pipeline_mode = #tpu.pipeline_mode<synchronous>, transform_indices = @transform_12, window_bounds = array<i64: 32, 8>}, {pipeline_mode = #tpu.pipeline_mode<synchronous>, transform_indices = @transform_13, window_bounds = array<i64: 48, 128>}]} {
    %c0 = arith.constant 0 : index
    %c0_0 = arith.constant 0 : index
    %0 = vector.load %arg1[%c0, %c0_0] : memref<48x16xf32, #tpu.memory_space<vmem>>, vector<48x16xf32>
    %c0_1 = arith.constant 0 : index
    %c0_2 = arith.constant 0 : index
    %1 = vector.load %arg3[%c0_1, %c0_2] : memref<16x32xf32, #tpu.memory_space<vmem>>, vector<16x32xf32>
    %cst = arith.constant dense<0.000000e+00> : vector<48x32xf32>
    %2 = tpu.matmul %0, %1, %cst {dimension_numbers = #tpu.dot_dimension_numbers<[1], [0], [0], [1], [0, 0, 1, 1], [], []>} : vector<48x16xf32>, vector<16x32xf32>, vector<48x32xf32> -> vector<48x32xf32>
    %c0_3 = arith.constant 0 : index
    %c0_4 = arith.constant 0 : index
    %3 = vector.load %arg4[%c0_3, %c0_4] : memref<1x32xf32, #tpu.memory_space<vmem>>, vector<1x32xf32>
    %4 = vector.broadcast %3 : vector<1x32xf32> to vector<48x32xf32>
    %5 = arith.addf %2, %4 : vector<48x32xf32>
    %cst_5 = arith.constant 0.000000e+00 : f32
    %6 = vector.broadcast %cst_5 : f32 to vector<48x32xf32>
    %7 = arith.maximumf %5, %6 : vector<48x32xf32>
    %c0_6 = arith.constant 0 : index
    %c0_7 = arith.constant 0 : index
    %8 = vector.load %arg5[%c0_6, %c0_7] : memref<32x128xf32, #tpu.memory_space<vmem>>, vector<32x128xf32>
    %cst_8 = arith.constant dense<0.000000e+00> : vector<48x128xf32>
    %9 = tpu.matmul %7, %8, %cst_8 {dimension_numbers = #tpu.dot_dimension_numbers<[1], [0], [0], [1], [0, 0, 1, 1], [], []>} : vector<48x32xf32>, vector<32x128xf32>, vector<48x128xf32> -> vector<48x128xf32>
    %c0_9 = arith.constant 0 : index
    %c0_10 = arith.constant 0 : index
    %10 = vector.load %arg7[%c0_9, %c0_10] : memref<1x128xf32, #tpu.memory_space<vmem>>, vector<1x128xf32>
    %11 = vector.broadcast %10 : vector<1x128xf32> to vector<48x128xf32>
    %12 = arith.addf %9, %11 : vector<48x128xf32>
    %c0_11 = arith.constant 0 : index
    %c0_12 = arith.constant 0 : index
    %13 = vector.load %arg6[%c0_11, %c0_12] : memref<32x128xf32, #tpu.memory_space<vmem>>, vector<32x128xf32>
    %c0_13 = arith.constant 0 : index
    %c0_14 = arith.constant 0 : index
    %14 = vector.load %arg8[%c0_13, %c0_14] : memref<32x128xf32, #tpu.memory_space<vmem>>, vector<32x128xf32>
    %c0_15 = arith.constant 0 : index
    %c0_16 = arith.constant 0 : index
    %15 = vector.load %arg9[%c0_15, %c0_16] : memref<1x128xf32, #tpu.memory_space<vmem>>, vector<1x128xf32>
    %c0_17 = arith.constant 0 : index
    %c0_18 = arith.constant 0 : index
    %16 = vector.load %arg10[%c0_17, %c0_18] : memref<32x32xf32, #tpu.memory_space<vmem>>, vector<32x32xf32>
    %c0_19 = arith.constant 0 : index
    %c0_20 = arith.constant 0 : index
    %17 = vector.load %arg11[%c0_19, %c0_20] : memref<8x8xf32, #tpu.memory_space<vmem>>, vector<8x8xf32>
    %c0_21 = arith.constant 0 : index
    %c0_22 = arith.constant 0 : index
    %18 = vector.load %arg12[%c0_21, %c0_22] : memref<8x32xf32, #tpu.memory_space<vmem>>, vector<8x32xf32>
    %c0_23 = arith.constant 0 : index
    %c0_24 = arith.constant 0 : index
    %19 = vector.load %arg13[%c0_23, %c0_24] : memref<32x8xf32, #tpu.memory_space<vmem>>, vector<32x8xf32>
    %cst_25 = arith.constant 0.000000e+00 : f32
    %20 = vector.broadcast %cst_25 : f32 to vector<8x88xf32>
    %c0_26 = arith.constant 0 : index
    %c0_27 = arith.constant 0 : index
    %21 = vector.load %arg2[%c0_26, %c0_27] : memref<8x32xf32, #tpu.memory_space<vmem>>, vector<8x32xf32>
    %22 = vector.extract_strided_slice %12 {offsets = [0, 0], sizes = [8, 128], strides = [1, 1]} : vector<48x128xf32> to vector<8x128xf32>
    %cst_28 = arith.constant dense<0.000000e+00> : vector<8x128xf32>
    %23 = tpu.matmul %21, %13, %cst_28 {dimension_numbers = #tpu.dot_dimension_numbers<[1], [0], [0], [1], [0, 0, 1, 1], [], []>} : vector<8x32xf32>, vector<32x128xf32>, vector<8x128xf32> -> vector<8x128xf32>
    %24 = arith.addf %22, %23 : vector<8x128xf32>
    %25 = vector.extract_strided_slice %24 {offsets = [0, 0], sizes = [8, 64], strides = [1, 1]} : vector<8x128xf32> to vector<8x64xf32>
    %26 = arith.negf %25 : vector<8x64xf32>
    %27 = math.exp %26 : vector<8x64xf32>
    %cst_29 = arith.constant 1.000000e+00 : f32
    %28 = vector.broadcast %cst_29 : f32 to vector<8x64xf32>
    %29 = arith.addf %28, %27 : vector<8x64xf32>
    %30 = arith.divf %28, %29 : vector<8x64xf32>
    %31 = vector.extract_strided_slice %30 {offsets = [0, 0], sizes = [8, 32], strides = [1, 1]} : vector<8x64xf32> to vector<8x32xf32>
    %32 = vector.extract_strided_slice %30 {offsets = [0, 32], sizes = [8, 32], strides = [1, 1]} : vector<8x64xf32> to vector<8x32xf32>
    %33 = vector.extract_strided_slice %24 {offsets = [0, 64], sizes = [8, 32], strides = [1, 1]} : vector<8x128xf32> to vector<8x32xf32>
    %34 = vector.extract_strided_slice %24 {offsets = [0, 96], sizes = [8, 32], strides = [1, 1]} : vector<8x128xf32> to vector<8x32xf32>
    %35 = arith.mulf %31, %34 : vector<8x32xf32>
    %36 = arith.addf %33, %35 : vector<8x32xf32>
    %37 = math.tanh %36 : vector<8x32xf32>
    %cst_30 = arith.constant 1.000000e+00 : f32
    %38 = vector.broadcast %cst_30 : f32 to vector<8x32xf32>
    %39 = arith.subf %38, %32 : vector<8x32xf32>
    %40 = arith.mulf %39, %37 : vector<8x32xf32>
    %41 = arith.mulf %32, %21 : vector<8x32xf32>
    %42 = arith.addf %40, %41 : vector<8x32xf32>
    %cst_31 = arith.constant dense<0.000000e+00> : vector<8x128xf32>
    %43 = tpu.matmul %42, %14, %cst_31 {dimension_numbers = #tpu.dot_dimension_numbers<[1], [0], [0], [1], [0, 0, 1, 1], [], []>} : vector<8x32xf32>, vector<32x128xf32>, vector<8x128xf32> -> vector<8x128xf32>
    %44 = vector.broadcast %15 : vector<1x128xf32> to vector<8x128xf32>
    %45 = arith.addf %43, %44 : vector<8x128xf32>
    %46 = vector.extract_strided_slice %45 {offsets = [0, 0], sizes = [8, 8], strides = [1, 1]} : vector<8x128xf32> to vector<8x8xf32>
    %47 = vector.extract_strided_slice %45 {offsets = [0, 8], sizes = [8, 1], strides = [1, 1]} : vector<8x128xf32> to vector<8x1xf32>
    %48 = vector.extract_strided_slice %45 {offsets = [0, 9], sizes = [8, 32], strides = [1, 1]} : vector<8x128xf32> to vector<8x32xf32>
    %49 = arith.negf %48 : vector<8x32xf32>
    %50 = math.exp %49 : vector<8x32xf32>
    %cst_32 = arith.constant 1.000000e+00 : f32
    %51 = vector.broadcast %cst_32 : f32 to vector<8x32xf32>
    %52 = arith.addf %51, %50 : vector<8x32xf32>
    %53 = arith.divf %51, %52 : vector<8x32xf32>
    %54 = vector.extract_strided_slice %45 {offsets = [0, 41], sizes = [8, 32], strides = [1, 1]} : vector<8x128xf32> to vector<8x32xf32>
    %cst_33 = arith.constant dense<0xFF800000> : vector<8xf32>
    %55 = vector.multi_reduction <maximumf>, %54, %cst_33 [1] : vector<8x32xf32> to vector<8xf32>
    %56 = vector.shape_cast %55 : vector<8xf32> to vector<8x1xf32>
    %57 = vector.broadcast %56 : vector<8x1xf32> to vector<8x32xf32>
    %58 = arith.subf %54, %57 : vector<8x32xf32>
    %59 = math.exp %58 : vector<8x32xf32>
    %cst_34 = arith.constant dense<0.000000e+00> : vector<8x32xf32>
    %60 = tpu.matmul %59, %16, %cst_34 {dimension_numbers = #tpu.dot_dimension_numbers<[1], [0], [0], [1], [0, 0, 1, 1], [], []>} : vector<8x32xf32>, vector<32x32xf32>, vector<8x32xf32> -> vector<8x32xf32>
    %cst_35 = arith.constant 1.000000e-30 : f32
    %61 = vector.broadcast %cst_35 : f32 to vector<8x32xf32>
    %62 = arith.maximumf %60, %61 : vector<8x32xf32>
    %63 = tpu.reciprocal %62 {approx = true} : vector<8x32xf32> -> vector<8x32xf32>
    %64 = vector.broadcast %47 : vector<8x1xf32> to vector<8x32xf32>
    %65 = arith.mulf %64, %53 : vector<8x32xf32>
    %66 = arith.mulf %59, %63 : vector<8x32xf32>
    %67 = arith.mulf %65, %66 : vector<8x32xf32>
    %cst_36 = arith.constant dense<0.000000e+00> : vector<8x32xf32>
    %68 = tpu.matmul %17, %67, %cst_36 {dimension_numbers = #tpu.dot_dimension_numbers<[1], [0], [0], [1], [0, 0, 1, 1], [], []>} : vector<8x8xf32>, vector<8x32xf32>, vector<8x32xf32> -> vector<8x32xf32>
    %69 = arith.mulf %68, %18 : vector<8x32xf32>
    %cst_37 = arith.constant dense<0.000000e+00> : vector<8x8xf32>
    %70 = tpu.matmul %69, %19, %cst_37 {dimension_numbers = #tpu.dot_dimension_numbers<[1], [0], [0], [1], [0, 0, 1, 1], [], []>} : vector<8x32xf32>, vector<32x8xf32>, vector<8x8xf32> -> vector<8x8xf32>
    %71 = arith.addf %46, %70 : vector<8x8xf32>
    %72 = tpu.concatenate %71, %42, %20 in 1 : vector<8x8xf32>, vector<8x32xf32>, vector<8x88xf32> -> vector<8x128xf32>
    %c0_38 = arith.constant 0 : index
    %c0_39 = arith.constant 0 : index
    %73 = vector.load %arg14[%c0_38, %c0_39] : memref<48x128xf32, #tpu.memory_space<vmem>>, vector<8x128xf32>
    tpu.vector_store %arg14[%c0_38, %c0_39], %72 {strides = array<i32>} : memref<48x128xf32, #tpu.memory_space<vmem>>, vector<8x128xf32>,
    %74 = vector.extract_strided_slice %12 {offsets = [8, 0], sizes = [8, 128], strides = [1, 1]} : vector<48x128xf32> to vector<8x128xf32>
    %cst_40 = arith.constant dense<0.000000e+00> : vector<8x128xf32>
    %75 = tpu.matmul %42, %13, %cst_40 {dimension_numbers = #tpu.dot_dimension_numbers<[1], [0], [0], [1], [0, 0, 1, 1], [], []>} : vector<8x32xf32>, vector<32x128xf32>, vector<8x128xf32> -> vector<8x128xf32>
    %76 = arith.addf %74, %75 : vector<8x128xf32>
    %77 = vector.extract_strided_slice %76 {offsets = [0, 0], sizes = [8, 64], strides = [1, 1]} : vector<8x128xf32> to vector<8x64xf32>
    %78 = arith.negf %77 : vector<8x64xf32>
    %79 = math.exp %78 : vector<8x64xf32>
    %cst_41 = arith.constant 1.000000e+00 : f32
    %80 = vector.broadcast %cst_41 : f32 to vector<8x64xf32>
    %81 = arith.addf %80, %79 : vector<8x64xf32>
    %82 = arith.divf %80, %81 : vector<8x64xf32>
    %83 = vector.extract_strided_slice %82 {offsets = [0, 0], sizes = [8, 32], strides = [1, 1]} : vector<8x64xf32> to vector<8x32xf32>
    %84 = vector.extract_strided_slice %82 {offsets = [0, 32], sizes = [8, 32], strides = [1, 1]} : vector<8x64xf32> to vector<8x32xf32>
    %85 = vector.extract_strided_slice %76 {offsets = [0, 64], sizes = [8, 32], strides = [1, 1]} : vector<8x128xf32> to vector<8x32xf32>
    %86 = vector.extract_strided_slice %76 {offsets = [0, 96], sizes = [8, 32], strides = [1, 1]} : vector<8x128xf32> to vector<8x32xf32>
    %87 = arith.mulf %83, %86 : vector<8x32xf32>
    %88 = arith.addf %85, %87 : vector<8x32xf32>
    %89 = math.tanh %88 : vector<8x32xf32>
    %cst_42 = arith.constant 1.000000e+00 : f32
    %90 = vector.broadcast %cst_42 : f32 to vector<8x32xf32>
    %91 = arith.subf %90, %84 : vector<8x32xf32>
    %92 = arith.mulf %91, %89 : vector<8x32xf32>
    %93 = arith.mulf %84, %42 : vector<8x32xf32>
    %94 = arith.addf %92, %93 : vector<8x32xf32>
    %cst_43 = arith.constant dense<0.000000e+00> : vector<8x128xf32>
    %95 = tpu.matmul %94, %14, %cst_43 {dimension_numbers = #tpu.dot_dimension_numbers<[1], [0], [0], [1], [0, 0, 1, 1], [], []>} : vector<8x32xf32>, vector<32x128xf32>, vector<8x128xf32> -> vector<8x128xf32>
    %96 = vector.broadcast %15 : vector<1x128xf32> to vector<8x128xf32>
    %97 = arith.addf %95, %96 : vector<8x128xf32>
    %98 = vector.extract_strided_slice %97 {offsets = [0, 0], sizes = [8, 8], strides = [1, 1]} : vector<8x128xf32> to vector<8x8xf32>
    %99 = vector.extract_strided_slice %97 {offsets = [0, 8], sizes = [8, 1], strides = [1, 1]} : vector<8x128xf32> to vector<8x1xf32>
    %100 = vector.extract_strided_slice %97 {offsets = [0, 9], sizes = [8, 32], strides = [1, 1]} : vector<8x128xf32> to vector<8x32xf32>
    %101 = arith.negf %100 : vector<8x32xf32>
    %102 = math.exp %101 : vector<8x32xf32>
    %cst_44 = arith.constant 1.000000e+00 : f32
    %103 = vector.broadcast %cst_44 : f32 to vector<8x32xf32>
    %104 = arith.addf %103, %102 : vector<8x32xf32>
    %105 = arith.divf %103, %104 : vector<8x32xf32>
    %106 = vector.extract_strided_slice %97 {offsets = [0, 41], sizes = [8, 32], strides = [1, 1]} : vector<8x128xf32> to vector<8x32xf32>
    %cst_45 = arith.constant dense<0xFF800000> : vector<8xf32>
    %107 = vector.multi_reduction <maximumf>, %106, %cst_45 [1] : vector<8x32xf32> to vector<8xf32>
    %108 = vector.shape_cast %107 : vector<8xf32> to vector<8x1xf32>
    %109 = vector.broadcast %108 : vector<8x1xf32> to vector<8x32xf32>
    %110 = arith.subf %106, %109 : vector<8x32xf32>
    %111 = math.exp %110 : vector<8x32xf32>
    %cst_46 = arith.constant dense<0.000000e+00> : vector<8x32xf32>
    %112 = tpu.matmul %111, %16, %cst_46 {dimension_numbers = #tpu.dot_dimension_numbers<[1], [0], [0], [1], [0, 0, 1, 1], [], []>} : vector<8x32xf32>, vector<32x32xf32>, vector<8x32xf32> -> vector<8x32xf32>
    %cst_47 = arith.constant 1.000000e-30 : f32
    %113 = vector.broadcast %cst_47 : f32 to vector<8x32xf32>
    %114 = arith.maximumf %112, %113 : vector<8x32xf32>
    %115 = tpu.reciprocal %114 {approx = true} : vector<8x32xf32> -> vector<8x32xf32>
    %116 = vector.broadcast %99 : vector<8x1xf32> to vector<8x32xf32>
    %117 = arith.mulf %116, %105 : vector<8x32xf32>
    %118 = arith.mulf %111, %115 : vector<8x32xf32>
    %119 = arith.mulf %117, %118 : vector<8x32xf32>
    %cst_48 = arith.constant dense<0.000000e+00> : vector<8x32xf32>
    %120 = tpu.matmul %17, %119, %cst_48 {dimension_numbers = #tpu.dot_dimension_numbers<[1], [0], [0], [1], [0, 0, 1, 1], [], []>} : vector<8x8xf32>, vector<8x32xf32>, vector<8x32xf32> -> vector<8x32xf32>
    %121 = arith.mulf %120, %18 : vector<8x32xf32>
    %cst_49 = arith.constant dense<0.000000e+00> : vector<8x8xf32>
    %122 = tpu.matmul %121, %19, %cst_49 {dimension_numbers = #tpu.dot_dimension_numbers<[1], [0], [0], [1], [0, 0, 1, 1], [], []>} : vector<8x32xf32>, vector<32x8xf32>, vector<8x8xf32> -> vector<8x8xf32>
    %123 = arith.addf %98, %122 : vector<8x8xf32>
    %124 = tpu.concatenate %123, %94, %20 in 1 : vector<8x8xf32>, vector<8x32xf32>, vector<8x88xf32> -> vector<8x128xf32>
    %c8 = arith.constant 8 : index
    %c0_50 = arith.constant 0 : index
    %125 = vector.load %arg14[%c8, %c0_50] : memref<48x128xf32, #tpu.memory_space<vmem>>, vector<8x128xf32>
    tpu.vector_store %arg14[%c8, %c0_50], %124 {strides = array<i32>} : memref<48x128xf32, #tpu.memory_space<vmem>>, vector<8x128xf32>,
    %126 = vector.extract_strided_slice %12 {offsets = [16, 0], sizes = [8, 128], strides = [1, 1]} : vector<48x128xf32> to vector<8x128xf32>
    %cst_51 = arith.constant dense<0.000000e+00> : vector<8x128xf32>
    %127 = tpu.matmul %94, %13, %cst_51 {dimension_numbers = #tpu.dot_dimension_numbers<[1], [0], [0], [1], [0, 0, 1, 1], [], []>} : vector<8x32xf32>, vector<32x128xf32>, vector<8x128xf32> -> vector<8x128xf32>
    %128 = arith.addf %126, %127 : vector<8x128xf32>
    %129 = vector.extract_strided_slice %128 {offsets = [0, 0], sizes = [8, 64], strides = [1, 1]} : vector<8x128xf32> to vector<8x64xf32>
    %130 = arith.negf %129 : vector<8x64xf32>
    %131 = math.exp %130 : vector<8x64xf32>
    %cst_52 = arith.constant 1.000000e+00 : f32
    %132 = vector.broadcast %cst_52 : f32 to vector<8x64xf32>
    %133 = arith.addf %132, %131 : vector<8x64xf32>
    %134 = arith.divf %132, %133 : vector<8x64xf32>
    %135 = vector.extract_strided_slice %134 {offsets = [0, 0], sizes = [8, 32], strides = [1, 1]} : vector<8x64xf32> to vector<8x32xf32>
    %136 = vector.extract_strided_slice %134 {offsets = [0, 32], sizes = [8, 32], strides = [1, 1]} : vector<8x64xf32> to vector<8x32xf32>
    %137 = vector.extract_strided_slice %128 {offsets = [0, 64], sizes = [8, 32], strides = [1, 1]} : vector<8x128xf32> to vector<8x32xf32>
    %138 = vector.extract_strided_slice %128 {offsets = [0, 96], sizes = [8, 32], strides = [1, 1]} : vector<8x128xf32> to vector<8x32xf32>
    %139 = arith.mulf %135, %138 : vector<8x32xf32>
    %140 = arith.addf %137, %139 : vector<8x32xf32>
    %141 = math.tanh %140 : vector<8x32xf32>
    %cst_53 = arith.constant 1.000000e+00 : f32
    %142 = vector.broadcast %cst_53 : f32 to vector<8x32xf32>
    %143 = arith.subf %142, %136 : vector<8x32xf32>
    %144 = arith.mulf %143, %141 : vector<8x32xf32>
    %145 = arith.mulf %136, %94 : vector<8x32xf32>
    %146 = arith.addf %144, %145 : vector<8x32xf32>
    %cst_54 = arith.constant dense<0.000000e+00> : vector<8x128xf32>
    %147 = tpu.matmul %146, %14, %cst_54 {dimension_numbers = #tpu.dot_dimension_numbers<[1], [0], [0], [1], [0, 0, 1, 1], [], []>} : vector<8x32xf32>, vector<32x128xf32>, vector<8x128xf32> -> vector<8x128xf32>
    %148 = vector.broadcast %15 : vector<1x128xf32> to vector<8x128xf32>
    %149 = arith.addf %147, %148 : vector<8x128xf32>
    %150 = vector.extract_strided_slice %149 {offsets = [0, 0], sizes = [8, 8], strides = [1, 1]} : vector<8x128xf32> to vector<8x8xf32>
    %151 = vector.extract_strided_slice %149 {offsets = [0, 8], sizes = [8, 1], strides = [1, 1]} : vector<8x128xf32> to vector<8x1xf32>
    %152 = vector.extract_strided_slice %149 {offsets = [0, 9], sizes = [8, 32], strides = [1, 1]} : vector<8x128xf32> to vector<8x32xf32>
    %153 = arith.negf %152 : vector<8x32xf32>
    %154 = math.exp %153 : vector<8x32xf32>
    %cst_55 = arith.constant 1.000000e+00 : f32
    %155 = vector.broadcast %cst_55 : f32 to vector<8x32xf32>
    %156 = arith.addf %155, %154 : vector<8x32xf32>
    %157 = arith.divf %155, %156 : vector<8x32xf32>
    %158 = vector.extract_strided_slice %149 {offsets = [0, 41], sizes = [8, 32], strides = [1, 1]} : vector<8x128xf32> to vector<8x32xf32>
    %cst_56 = arith.constant dense<0xFF800000> : vector<8xf32>
    %159 = vector.multi_reduction <maximumf>, %158, %cst_56 [1] : vector<8x32xf32> to vector<8xf32>
    %160 = vector.shape_cast %159 : vector<8xf32> to vector<8x1xf32>
    %161 = vector.broadcast %160 : vector<8x1xf32> to vector<8x32xf32>
    %162 = arith.subf %158, %161 : vector<8x32xf32>
    %163 = math.exp %162 : vector<8x32xf32>
    %cst_57 = arith.constant dense<0.000000e+00> : vector<8x32xf32>
    %164 = tpu.matmul %163, %16, %cst_57 {dimension_numbers = #tpu.dot_dimension_numbers<[1], [0], [0], [1], [0, 0, 1, 1], [], []>} : vector<8x32xf32>, vector<32x32xf32>, vector<8x32xf32> -> vector<8x32xf32>
    %cst_58 = arith.constant 1.000000e-30 : f32
    %165 = vector.broadcast %cst_58 : f32 to vector<8x32xf32>
    %166 = arith.maximumf %164, %165 : vector<8x32xf32>
    %167 = tpu.reciprocal %166 {approx = true} : vector<8x32xf32> -> vector<8x32xf32>
    %168 = vector.broadcast %151 : vector<8x1xf32> to vector<8x32xf32>
    %169 = arith.mulf %168, %157 : vector<8x32xf32>
    %170 = arith.mulf %163, %167 : vector<8x32xf32>
    %171 = arith.mulf %169, %170 : vector<8x32xf32>
    %cst_59 = arith.constant dense<0.000000e+00> : vector<8x32xf32>
    %172 = tpu.matmul %17, %171, %cst_59 {dimension_numbers = #tpu.dot_dimension_numbers<[1], [0], [0], [1], [0, 0, 1, 1], [], []>} : vector<8x8xf32>, vector<8x32xf32>, vector<8x32xf32> -> vector<8x32xf32>
    %173 = arith.mulf %172, %18 : vector<8x32xf32>
    %cst_60 = arith.constant dense<0.000000e+00> : vector<8x8xf32>
    %174 = tpu.matmul %173, %19, %cst_60 {dimension_numbers = #tpu.dot_dimension_numbers<[1], [0], [0], [1], [0, 0, 1, 1], [], []>} : vector<8x32xf32>, vector<32x8xf32>, vector<8x8xf32> -> vector<8x8xf32>
    %175 = arith.addf %150, %174 : vector<8x8xf32>
    %176 = tpu.concatenate %175, %146, %20 in 1 : vector<8x8xf32>, vector<8x32xf32>, vector<8x88xf32> -> vector<8x128xf32>
    %c16 = arith.constant 16 : index
    %c0_61 = arith.constant 0 : index
    %177 = vector.load %arg14[%c16, %c0_61] : memref<48x128xf32, #tpu.memory_space<vmem>>, vector<8x128xf32>
    tpu.vector_store %arg14[%c16, %c0_61], %176 {strides = array<i32>} : memref<48x128xf32, #tpu.memory_space<vmem>>, vector<8x128xf32>,
    %178 = vector.extract_strided_slice %12 {offsets = [24, 0], sizes = [8, 128], strides = [1, 1]} : vector<48x128xf32> to vector<8x128xf32>
    %cst_62 = arith.constant dense<0.000000e+00> : vector<8x128xf32>
    %179 = tpu.matmul %146, %13, %cst_62 {dimension_numbers = #tpu.dot_dimension_numbers<[1], [0], [0], [1], [0, 0, 1, 1], [], []>} : vector<8x32xf32>, vector<32x128xf32>, vector<8x128xf32> -> vector<8x128xf32>
    %180 = arith.addf %178, %179 : vector<8x128xf32>
    %181 = vector.extract_strided_slice %180 {offsets = [0, 0], sizes = [8, 64], strides = [1, 1]} : vector<8x128xf32> to vector<8x64xf32>
    %182 = arith.negf %181 : vector<8x64xf32>
    %183 = math.exp %182 : vector<8x64xf32>
    %cst_63 = arith.constant 1.000000e+00 : f32
    %184 = vector.broadcast %cst_63 : f32 to vector<8x64xf32>
    %185 = arith.addf %184, %183 : vector<8x64xf32>
    %186 = arith.divf %184, %185 : vector<8x64xf32>
    %187 = vector.extract_strided_slice %186 {offsets = [0, 0], sizes = [8, 32], strides = [1, 1]} : vector<8x64xf32> to vector<8x32xf32>
    %188 = vector.extract_strided_slice %186 {offsets = [0, 32], sizes = [8, 32], strides = [1, 1]} : vector<8x64xf32> to vector<8x32xf32>
    %189 = vector.extract_strided_slice %180 {offsets = [0, 64], sizes = [8, 32], strides = [1, 1]} : vector<8x128xf32> to vector<8x32xf32>
    %190 = vector.extract_strided_slice %180 {offsets = [0, 96], sizes = [8, 32], strides = [1, 1]} : vector<8x128xf32> to vector<8x32xf32>
    %191 = arith.mulf %187, %190 : vector<8x32xf32>
    %192 = arith.addf %189, %191 : vector<8x32xf32>
    %193 = math.tanh %192 : vector<8x32xf32>
    %cst_64 = arith.constant 1.000000e+00 : f32
    %194 = vector.broadcast %cst_64 : f32 to vector<8x32xf32>
    %195 = arith.subf %194, %188 : vector<8x32xf32>
    %196 = arith.mulf %195, %193 : vector<8x32xf32>
    %197 = arith.mulf %188, %146 : vector<8x32xf32>
    %198 = arith.addf %196, %197 : vector<8x32xf32>
    %cst_65 = arith.constant dense<0.000000e+00> : vector<8x128xf32>
    %199 = tpu.matmul %198, %14, %cst_65 {dimension_numbers = #tpu.dot_dimension_numbers<[1], [0], [0], [1], [0, 0, 1, 1], [], []>} : vector<8x32xf32>, vector<32x128xf32>, vector<8x128xf32> -> vector<8x128xf32>
    %200 = vector.broadcast %15 : vector<1x128xf32> to vector<8x128xf32>
    %201 = arith.addf %199, %200 : vector<8x128xf32>
    %202 = vector.extract_strided_slice %201 {offsets = [0, 0], sizes = [8, 8], strides = [1, 1]} : vector<8x128xf32> to vector<8x8xf32>
    %203 = vector.extract_strided_slice %201 {offsets = [0, 8], sizes = [8, 1], strides = [1, 1]} : vector<8x128xf32> to vector<8x1xf32>
    %204 = vector.extract_strided_slice %201 {offsets = [0, 9], sizes = [8, 32], strides = [1, 1]} : vector<8x128xf32> to vector<8x32xf32>
    %205 = arith.negf %204 : vector<8x32xf32>
    %206 = math.exp %205 : vector<8x32xf32>
    %cst_66 = arith.constant 1.000000e+00 : f32
    %207 = vector.broadcast %cst_66 : f32 to vector<8x32xf32>
    %208 = arith.addf %207, %206 : vector<8x32xf32>
    %209 = arith.divf %207, %208 : vector<8x32xf32>
    %210 = vector.extract_strided_slice %201 {offsets = [0, 41], sizes = [8, 32], strides = [1, 1]} : vector<8x128xf32> to vector<8x32xf32>
    %cst_67 = arith.constant dense<0xFF800000> : vector<8xf32>
    %211 = vector.multi_reduction <maximumf>, %210, %cst_67 [1] : vector<8x32xf32> to vector<8xf32>
    %212 = vector.shape_cast %211 : vector<8xf32> to vector<8x1xf32>
    %213 = vector.broadcast %212 : vector<8x1xf32> to vector<8x32xf32>
    %214 = arith.subf %210, %213 : vector<8x32xf32>
    %215 = math.exp %214 : vector<8x32xf32>
    %cst_68 = arith.constant dense<0.000000e+00> : vector<8x32xf32>
    %216 = tpu.matmul %215, %16, %cst_68 {dimension_numbers = #tpu.dot_dimension_numbers<[1], [0], [0], [1], [0, 0, 1, 1], [], []>} : vector<8x32xf32>, vector<32x32xf32>, vector<8x32xf32> -> vector<8x32xf32>
    %cst_69 = arith.constant 1.000000e-30 : f32
    %217 = vector.broadcast %cst_69 : f32 to vector<8x32xf32>
    %218 = arith.maximumf %216, %217 : vector<8x32xf32>
    %219 = tpu.reciprocal %218 {approx = true} : vector<8x32xf32> -> vector<8x32xf32>
    %220 = vector.broadcast %203 : vector<8x1xf32> to vector<8x32xf32>
    %221 = arith.mulf %220, %209 : vector<8x32xf32>
    %222 = arith.mulf %215, %219 : vector<8x32xf32>
    %223 = arith.mulf %221, %222 : vector<8x32xf32>
    %cst_70 = arith.constant dense<0.000000e+00> : vector<8x32xf32>
    %224 = tpu.matmul %17, %223, %cst_70 {dimension_numbers = #tpu.dot_dimension_numbers<[1], [0], [0], [1], [0, 0, 1, 1], [], []>} : vector<8x8xf32>, vector<8x32xf32>, vector<8x32xf32> -> vector<8x32xf32>
    %225 = arith.mulf %224, %18 : vector<8x32xf32>
    %cst_71 = arith.constant dense<0.000000e+00> : vector<8x8xf32>
    %226 = tpu.matmul %225, %19, %cst_71 {dimension_numbers = #tpu.dot_dimension_numbers<[1], [0], [0], [1], [0, 0, 1, 1], [], []>} : vector<8x32xf32>, vector<32x8xf32>, vector<8x8xf32> -> vector<8x8xf32>
    %227 = arith.addf %202, %226 : vector<8x8xf32>
    %228 = tpu.concatenate %227, %198, %20 in 1 : vector<8x8xf32>, vector<8x32xf32>, vector<8x88xf32> -> vector<8x128xf32>
    %c24 = arith.constant 24 : index
    %c0_72 = arith.constant 0 : index
    %229 = vector.load %arg14[%c24, %c0_72] : memref<48x128xf32, #tpu.memory_space<vmem>>, vector<8x128xf32>
    tpu.vector_store %arg14[%c24, %c0_72], %228 {strides = array<i32>} : memref<48x128xf32, #tpu.memory_space<vmem>>, vector<8x128xf32>,
    %230 = vector.extract_strided_slice %12 {offsets = [32, 0], sizes = [8, 128], strides = [1, 1]} : vector<48x128xf32> to vector<8x128xf32>
    %cst_73 = arith.constant dense<0.000000e+00> : vector<8x128xf32>
    %231 = tpu.matmul %198, %13, %cst_73 {dimension_numbers = #tpu.dot_dimension_numbers<[1], [0], [0], [1], [0, 0, 1, 1], [], []>} : vector<8x32xf32>, vector<32x128xf32>, vector<8x128xf32> -> vector<8x128xf32>
    %232 = arith.addf %230, %231 : vector<8x128xf32>
    %233 = vector.extract_strided_slice %232 {offsets = [0, 0], sizes = [8, 64], strides = [1, 1]} : vector<8x128xf32> to vector<8x64xf32>
    %234 = arith.negf %233 : vector<8x64xf32>
    %235 = math.exp %234 : vector<8x64xf32>
    %cst_74 = arith.constant 1.000000e+00 : f32
    %236 = vector.broadcast %cst_74 : f32 to vector<8x64xf32>
    %237 = arith.addf %236, %235 : vector<8x64xf32>
    %238 = arith.divf %236, %237 : vector<8x64xf32>
    %239 = vector.extract_strided_slice %238 {offsets = [0, 0], sizes = [8, 32], strides = [1, 1]} : vector<8x64xf32> to vector<8x32xf32>
    %240 = vector.extract_strided_slice %238 {offsets = [0, 32], sizes = [8, 32], strides = [1, 1]} : vector<8x64xf32> to vector<8x32xf32>
    %241 = vector.extract_strided_slice %232 {offsets = [0, 64], sizes = [8, 32], strides = [1, 1]} : vector<8x128xf32> to vector<8x32xf32>
    %242 = vector.extract_strided_slice %232 {offsets = [0, 96], sizes = [8, 32], strides = [1, 1]} : vector<8x128xf32> to vector<8x32xf32>
    %243 = arith.mulf %239, %242 : vector<8x32xf32>
    %244 = arith.addf %241, %243 : vector<8x32xf32>
    %245 = math.tanh %244 : vector<8x32xf32>
    %cst_75 = arith.constant 1.000000e+00 : f32
    %246 = vector.broadcast %cst_75 : f32 to vector<8x32xf32>
    %247 = arith.subf %246, %240 : vector<8x32xf32>
    %248 = arith.mulf %247, %245 : vector<8x32xf32>
    %249 = arith.mulf %240, %198 : vector<8x32xf32>
    %250 = arith.addf %248, %249 : vector<8x32xf32>
    %cst_76 = arith.constant dense<0.000000e+00> : vector<8x128xf32>
    %251 = tpu.matmul %250, %14, %cst_76 {dimension_numbers = #tpu.dot_dimension_numbers<[1], [0], [0], [1], [0, 0, 1, 1], [], []>} : vector<8x32xf32>, vector<32x128xf32>, vector<8x128xf32> -> vector<8x128xf32>
    %252 = vector.broadcast %15 : vector<1x128xf32> to vector<8x128xf32>
    %253 = arith.addf %251, %252 : vector<8x128xf32>
    %254 = vector.extract_strided_slice %253 {offsets = [0, 0], sizes = [8, 8], strides = [1, 1]} : vector<8x128xf32> to vector<8x8xf32>
    %255 = vector.extract_strided_slice %253 {offsets = [0, 8], sizes = [8, 1], strides = [1, 1]} : vector<8x128xf32> to vector<8x1xf32>
    %256 = vector.extract_strided_slice %253 {offsets = [0, 9], sizes = [8, 32], strides = [1, 1]} : vector<8x128xf32> to vector<8x32xf32>
    %257 = arith.negf %256 : vector<8x32xf32>
    %258 = math.exp %257 : vector<8x32xf32>
    %cst_77 = arith.constant 1.000000e+00 : f32
    %259 = vector.broadcast %cst_77 : f32 to vector<8x32xf32>
    %260 = arith.addf %259, %258 : vector<8x32xf32>
    %261 = arith.divf %259, %260 : vector<8x32xf32>
    %262 = vector.extract_strided_slice %253 {offsets = [0, 41], sizes = [8, 32], strides = [1, 1]} : vector<8x128xf32> to vector<8x32xf32>
    %cst_78 = arith.constant dense<0xFF800000> : vector<8xf32>
    %263 = vector.multi_reduction <maximumf>, %262, %cst_78 [1] : vector<8x32xf32> to vector<8xf32>
    %264 = vector.shape_cast %263 : vector<8xf32> to vector<8x1xf32>
    %265 = vector.broadcast %264 : vector<8x1xf32> to vector<8x32xf32>
    %266 = arith.subf %262, %265 : vector<8x32xf32>
    %267 = math.exp %266 : vector<8x32xf32>
    %cst_79 = arith.constant dense<0.000000e+00> : vector<8x32xf32>
    %268 = tpu.matmul %267, %16, %cst_79 {dimension_numbers = #tpu.dot_dimension_numbers<[1], [0], [0], [1], [0, 0, 1, 1], [], []>} : vector<8x32xf32>, vector<32x32xf32>, vector<8x32xf32> -> vector<8x32xf32>
    %cst_80 = arith.constant 1.000000e-30 : f32
    %269 = vector.broadcast %cst_80 : f32 to vector<8x32xf32>
    %270 = arith.maximumf %268, %269 : vector<8x32xf32>
    %271 = tpu.reciprocal %270 {approx = true} : vector<8x32xf32> -> vector<8x32xf32>
    %272 = vector.broadcast %255 : vector<8x1xf32> to vector<8x32xf32>
    %273 = arith.mulf %272, %261 : vector<8x32xf32>
    %274 = arith.mulf %267, %271 : vector<8x32xf32>
    %275 = arith.mulf %273, %274 : vector<8x32xf32>
    %cst_81 = arith.constant dense<0.000000e+00> : vector<8x32xf32>
    %276 = tpu.matmul %17, %275, %cst_81 {dimension_numbers = #tpu.dot_dimension_numbers<[1], [0], [0], [1], [0, 0, 1, 1], [], []>} : vector<8x8xf32>, vector<8x32xf32>, vector<8x32xf32> -> vector<8x32xf32>
    %277 = arith.mulf %276, %18 : vector<8x32xf32>
    %cst_82 = arith.constant dense<0.000000e+00> : vector<8x8xf32>
    %278 = tpu.matmul %277, %19, %cst_82 {dimension_numbers = #tpu.dot_dimension_numbers<[1], [0], [0], [1], [0, 0, 1, 1], [], []>} : vector<8x32xf32>, vector<32x8xf32>, vector<8x8xf32> -> vector<8x8xf32>
    %279 = arith.addf %254, %278 : vector<8x8xf32>
    %280 = tpu.concatenate %279, %250, %20 in 1 : vector<8x8xf32>, vector<8x32xf32>, vector<8x88xf32> -> vector<8x128xf32>
    %c32 = arith.constant 32 : index
    %c0_83 = arith.constant 0 : index
    %281 = vector.load %arg14[%c32, %c0_83] : memref<48x128xf32, #tpu.memory_space<vmem>>, vector<8x128xf32>
    tpu.vector_store %arg14[%c32, %c0_83], %280 {strides = array<i32>} : memref<48x128xf32, #tpu.memory_space<vmem>>, vector<8x128xf32>,
    %282 = vector.extract_strided_slice %12 {offsets = [40, 0], sizes = [8, 128], strides = [1, 1]} : vector<48x128xf32> to vector<8x128xf32>
    %cst_84 = arith.constant dense<0.000000e+00> : vector<8x128xf32>
    %283 = tpu.matmul %250, %13, %cst_84 {dimension_numbers = #tpu.dot_dimension_numbers<[1], [0], [0], [1], [0, 0, 1, 1], [], []>} : vector<8x32xf32>, vector<32x128xf32>, vector<8x128xf32> -> vector<8x128xf32>
    %284 = arith.addf %282, %283 : vector<8x128xf32>
    %285 = vector.extract_strided_slice %284 {offsets = [0, 0], sizes = [8, 64], strides = [1, 1]} : vector<8x128xf32> to vector<8x64xf32>
    %286 = arith.negf %285 : vector<8x64xf32>
    %287 = math.exp %286 : vector<8x64xf32>
    %cst_85 = arith.constant 1.000000e+00 : f32
    %288 = vector.broadcast %cst_85 : f32 to vector<8x64xf32>
    %289 = arith.addf %288, %287 : vector<8x64xf32>
    %290 = arith.divf %288, %289 : vector<8x64xf32>
    %291 = vector.extract_strided_slice %290 {offsets = [0, 0], sizes = [8, 32], strides = [1, 1]} : vector<8x64xf32> to vector<8x32xf32>
    %292 = vector.extract_strided_slice %290 {offsets = [0, 32], sizes = [8, 32], strides = [1, 1]} : vector<8x64xf32> to vector<8x32xf32>
    %293 = vector.extract_strided_slice %284 {offsets = [0, 64], sizes = [8, 32], strides = [1, 1]} : vector<8x128xf32> to vector<8x32xf32>
    %294 = vector.extract_strided_slice %284 {offsets = [0, 96], sizes = [8, 32], strides = [1, 1]} : vector<8x128xf32> to vector<8x32xf32>
    %295 = arith.mulf %291, %294 : vector<8x32xf32>
    %296 = arith.addf %293, %295 : vector<8x32xf32>
    %297 = math.tanh %296 : vector<8x32xf32>
    %cst_86 = arith.constant 1.000000e+00 : f32
    %298 = vector.broadcast %cst_86 : f32 to vector<8x32xf32>
    %299 = arith.subf %298, %292 : vector<8x32xf32>
    %300 = arith.mulf %299, %297 : vector<8x32xf32>
    %301 = arith.mulf %292, %250 : vector<8x32xf32>
    %302 = arith.addf %300, %301 : vector<8x32xf32>
    %cst_87 = arith.constant dense<0.000000e+00> : vector<8x128xf32>
    %303 = tpu.matmul %302, %14, %cst_87 {dimension_numbers = #tpu.dot_dimension_numbers<[1], [0], [0], [1], [0, 0, 1, 1], [], []>} : vector<8x32xf32>, vector<32x128xf32>, vector<8x128xf32> -> vector<8x128xf32>
    %304 = vector.broadcast %15 : vector<1x128xf32> to vector<8x128xf32>
    %305 = arith.addf %303, %304 : vector<8x128xf32>
    %306 = vector.extract_strided_slice %305 {offsets = [0, 0], sizes = [8, 8], strides = [1, 1]} : vector<8x128xf32> to vector<8x8xf32>
    %307 = vector.extract_strided_slice %305 {offsets = [0, 8], sizes = [8, 1], strides = [1, 1]} : vector<8x128xf32> to vector<8x1xf32>
    %308 = vector.extract_strided_slice %305 {offsets = [0, 9], sizes = [8, 32], strides = [1, 1]} : vector<8x128xf32> to vector<8x32xf32>
    %309 = arith.negf %308 : vector<8x32xf32>
    %310 = math.exp %309 : vector<8x32xf32>
    %cst_88 = arith.constant 1.000000e+00 : f32
    %311 = vector.broadcast %cst_88 : f32 to vector<8x32xf32>
    %312 = arith.addf %311, %310 : vector<8x32xf32>
    %313 = arith.divf %311, %312 : vector<8x32xf32>
    %314 = vector.extract_strided_slice %305 {offsets = [0, 41], sizes = [8, 32], strides = [1, 1]} : vector<8x128xf32> to vector<8x32xf32>
    %cst_89 = arith.constant dense<0xFF800000> : vector<8xf32>
    %315 = vector.multi_reduction <maximumf>, %314, %cst_89 [1] : vector<8x32xf32> to vector<8xf32>
    %316 = vector.shape_cast %315 : vector<8xf32> to vector<8x1xf32>
    %317 = vector.broadcast %316 : vector<8x1xf32> to vector<8x32xf32>
    %318 = arith.subf %314, %317 : vector<8x32xf32>
    %319 = math.exp %318 : vector<8x32xf32>
    %cst_90 = arith.constant dense<0.000000e+00> : vector<8x32xf32>
    %320 = tpu.matmul %319, %16, %cst_90 {dimension_numbers = #tpu.dot_dimension_numbers<[1], [0], [0], [1], [0, 0, 1, 1], [], []>} : vector<8x32xf32>, vector<32x32xf32>, vector<8x32xf32> -> vector<8x32xf32>
    %cst_91 = arith.constant 1.000000e-30 : f32
    %321 = vector.broadcast %cst_91 : f32 to vector<8x32xf32>
    %322 = arith.maximumf %320, %321 : vector<8x32xf32>
    %323 = tpu.reciprocal %322 {approx = true} : vector<8x32xf32> -> vector<8x32xf32>
    %324 = vector.broadcast %307 : vector<8x1xf32> to vector<8x32xf32>
    %325 = arith.mulf %324, %313 : vector<8x32xf32>
    %326 = arith.mulf %319, %323 : vector<8x32xf32>
    %327 = arith.mulf %325, %326 : vector<8x32xf32>
    %cst_92 = arith.constant dense<0.000000e+00> : vector<8x32xf32>
    %328 = tpu.matmul %17, %327, %cst_92 {dimension_numbers = #tpu.dot_dimension_numbers<[1], [0], [0], [1], [0, 0, 1, 1], [], []>} : vector<8x8xf32>, vector<8x32xf32>, vector<8x32xf32> -> vector<8x32xf32>
    %329 = arith.mulf %328, %18 : vector<8x32xf32>
    %cst_93 = arith.constant dense<0.000000e+00> : vector<8x8xf32>
    %330 = tpu.matmul %329, %19, %cst_93 {dimension_numbers = #tpu.dot_dimension_numbers<[1], [0], [0], [1], [0, 0, 1, 1], [], []>} : vector<8x32xf32>, vector<32x8xf32>, vector<8x8xf32> -> vector<8x8xf32>
    %331 = arith.addf %306, %330 : vector<8x8xf32>
    %332 = tpu.concatenate %331, %302, %20 in 1 : vector<8x8xf32>, vector<8x32xf32>, vector<8x88xf32> -> vector<8x128xf32>
    %c40 = arith.constant 40 : index
    %c0_94 = arith.constant 0 : index
    %333 = vector.load %arg14[%c40, %c0_94] : memref<48x128xf32, #tpu.memory_space<vmem>>, vector<8x128xf32>
    tpu.vector_store %arg14[%c40, %c0_94], %332 {strides = array<i32>} : memref<48x128xf32, #tpu.memory_space<vmem>>, vector<8x128xf32>,
    return
  }
  func.func @transform_0(%arg0: i32) -> (i32, i32) {
    %c0_i32 = arith.constant 0 : i32
    %c0_i32_0 = arith.constant 0 : i32
    %c0_i32_1 = arith.constant 0 : i32
    return %c0_i32, %c0_i32_0 : i32, i32
  }
  func.func @transform_1(%arg0: i32) -> (i32, i32) {
    %c0_i32 = arith.constant 0 : i32
    %c0_i32_0 = arith.constant 0 : i32
    %c0_i32_1 = arith.constant 0 : i32
    return %c0_i32, %c0_i32_0 : i32, i32
  }
  func.func @transform_2(%arg0: i32) -> (i32, i32) {
    %c0_i32 = arith.constant 0 : i32
    %c0_i32_0 = arith.constant 0 : i32
    %c0_i32_1 = arith.constant 0 : i32
    return %c0_i32, %c0_i32_0 : i32, i32
  }
  func.func @transform_3(%arg0: i32) -> (i32, i32) {
    %c0_i32 = arith.constant 0 : i32
    %c0_i32_0 = arith.constant 0 : i32
    %c0_i32_1 = arith.constant 0 : i32
    return %c0_i32, %c0_i32_0 : i32, i32
  }
  func.func @transform_4(%arg0: i32) -> (i32, i32) {
    %c0_i32 = arith.constant 0 : i32
    %c0_i32_0 = arith.constant 0 : i32
    %c0_i32_1 = arith.constant 0 : i32
    return %c0_i32, %c0_i32_0 : i32, i32
  }
  func.func @transform_5(%arg0: i32) -> (i32, i32) {
    %c0_i32 = arith.constant 0 : i32
    %c0_i32_0 = arith.constant 0 : i32
    %c0_i32_1 = arith.constant 0 : i32
    return %c0_i32, %c0_i32_0 : i32, i32
  }
  func.func @transform_6(%arg0: i32) -> (i32, i32) {
    %c0_i32 = arith.constant 0 : i32
    %c0_i32_0 = arith.constant 0 : i32
    %c0_i32_1 = arith.constant 0 : i32
    return %c0_i32, %c0_i32_0 : i32, i32
  }
  func.func @transform_7(%arg0: i32) -> (i32, i32) {
    %c0_i32 = arith.constant 0 : i32
    %c0_i32_0 = arith.constant 0 : i32
    %c0_i32_1 = arith.constant 0 : i32
    return %c0_i32, %c0_i32_0 : i32, i32
  }
  func.func @transform_8(%arg0: i32) -> (i32, i32) {
    %c0_i32 = arith.constant 0 : i32
    %c0_i32_0 = arith.constant 0 : i32
    %c0_i32_1 = arith.constant 0 : i32
    return %c0_i32, %c0_i32_0 : i32, i32
  }
  func.func @transform_9(%arg0: i32) -> (i32, i32) {
    %c0_i32 = arith.constant 0 : i32
    %c0_i32_0 = arith.constant 0 : i32
    %c0_i32_1 = arith.constant 0 : i32
    return %c0_i32, %c0_i32_0 : i32, i32
  }
  func.func @transform_10(%arg0: i32) -> (i32, i32) {
    %c0_i32 = arith.constant 0 : i32
    %c0_i32_0 = arith.constant 0 : i32
    %c0_i32_1 = arith.constant 0 : i32
    return %c0_i32, %c0_i32_0 : i32, i32
  }
  func.func @transform_11(%arg0: i32) -> (i32, i32) {
    %c0_i32 = arith.constant 0 : i32
    %c0_i32_0 = arith.constant 0 : i32
    %c0_i32_1 = arith.constant 0 : i32
    return %c0_i32, %c0_i32_0 : i32, i32
  }
  func.func @transform_12(%arg0: i32) -> (i32, i32) {
    %c0_i32 = arith.constant 0 : i32
    %c0_i32_0 = arith.constant 0 : i32
    %c0_i32_1 = arith.constant 0 : i32
    return %c0_i32, %c0_i32_0 : i32, i32
  }
  func.func @transform_13(%arg0: i32) -> (i32, i32) {
    %c0_i32 = arith.constant 0 : i32
    %c0_i32_0 = arith.constant 0 : i32
    %c0_i32_1 = arith.constant 0 : i32
    return %c0_i32, %c0_i32_0 : i32, i32
  }
}

</mosaic_0001>

<bundles_post_ra>
// kernel: tpu_custom_call.1
= control target key start
LH: loop header
LB: loop body
LE: loop exit
PB: predicated region body
PF: predicated region fallthrough
CT: control target
= control target key end

     0   :  { %18 = vsyncpa [#allocation3], 0  ;;  %s4578_s0 = inlined_call_operand.vmem [shape: f32[48,16], index: 0, kind: input, shape index: {}]   ;;  %s4579_s1 = inlined_call_operand.vmem [shape: f32[8,32], index: 1, kind: input, shape index: {}]   ;;  %s4580_s2 = inlined_call_operand.hbm [shape: f32[16,32], index: 2, kind: input, shape index: {}]   ;;  %s4581_s3 = inlined_call_operand.hbm [shape: f32[1,32], index: 3, kind: input, shape index: {}]   ;;  %s4582_s4 = inlined_call_operand.vmem [shape: f32[32,128], index: 4, kind: input, shape index: {}]   ;;  %s4583_s5 = inlined_call_operand.vmem [shape: f32[32,128], index: 5, kind: input, shape index: {}]   ;;  %s4584_s6 = inlined_call_operand.hbm [shape: f32[1,128], index: 6, kind: input, shape index: {}]   ;;  %s4585_s7 = inlined_call_operand.vmem [shape: f32[32,128], index: 7, kind: input, shape index: {}]   ;;  %s4586_s8 = inlined_call_operand.hbm [shape: f32[1,128], index: 8, kind: input, shape index: {}]   ;;  %s4587_s9 = inlined_call_operand.hbm [shape: f32[32,32], index: 9, kind: input, shape index: {}]   ;;  %s4588_s10 = inlined_call_operand.vmem [shape: f32[8,8], index: 10, kind: input, shape index: {}]   ;;  %s4589_s11 = inlined_call_operand.hbm [shape: f32[8,32], index: 11, kind: input, shape index: {}]   ;;  %s4590_s12 = inlined_call_operand.vmem [shape: f32[32,8], index: 12, kind: input, shape index: {}]   ;;  %s4591_s13 = inlined_call_operand.hbm [shape: f32[48,128], index: 13, kind: output, shape index: {}]  }
   0x1   :  { %19 = vsyncpa [#allocation6], 0 }
   0x2   :  { %20 = vsyncpa [#allocation9], 0 }
   0x3   :  { %21 = vsyncpa [#allocation12], 0 }
   0x4   :  { %22 = vsyncpa [#allocation4], 0  ;;  %s3828_s25 = smov [#allocation5]   ;;  %s3829_s27 = smov [#allocation8]  }
   0x5   :  { %s45_s26 = sshll.u32 %s3828_s25, 4  ;;  %s71_s28 = sshll.u32 %s3829_s27, 4  ;;  %s46_s26 = int_to_ptr.vmem [resolvable:$true] %s45_s26  ;;  %s72_s28 = int_to_ptr.vmem [resolvable:$true] %s71_s28 }
   0x6   :  { %s3686_s29 = scalar_lea.vmem %s46_s26, 16  ;;  %s3690_s30 = scalar_lea.vmem %s46_s26, 32 }
   0x7   :  { %p3687_p0 = scmp.ne.s32.totalorder %s46_s26, %s3686_s29  ;;  %p3691_p1 = scmp.lt.s32.totalorder %s46_s26, %s46_s26 }
   0x8   :  { %p3692_p2 = scmp.lt.s32.totalorder %s3690_s30, %s3686_s29 }
   0xa   :  { %p3693_p3 = por %p3692_p2, %p3691_p1 }
   0xc   :  { %p3694_p4 = pnand %p3693_p3, %p3687_p0 }
   0xe   :  { %3697 = shalt.err (!%p3694_p4)
}
   0xf   :  { %48 = dma.hbm_to_vmem [thread:$0]  %s4581_s3, 16, %s46_s26, [#allocation6]  }
  0x10   :  { %s3706_s16 = scalar_lea.vmem %s72_s28, 16  ;;  %s3710_s17 = scalar_lea.vmem %s72_s28, 32 }
  0x11   :  { %p3707_p5 = scmp.ne.s32.totalorder %s72_s28, %s3706_s16  ;;  %p3711_p6 = scmp.lt.s32.totalorder %s72_s28, %s72_s28 }
  0x12   :  { %p3712_p7 = scmp.lt.s32.totalorder %s3710_s17, %s3706_s16 }
  0x14   :  { %p3713_p8 = por %p3712_p7, %p3711_p6 }
  0x16   :  { %p3714_p9 = pnand %p3713_p8, %p3707_p5 }
  0x18   :  { %3717 = shalt.err (!%p3714_p9)
}
  0x19   :  { %74 = dma.hbm_to_vmem [thread:$0]  %s4586_s8, 16, %s72_s28, [#allocation9]  }
  0x1a   :  { %s3830_s20 = smov [#allocation2]  }
  0x1b   :  { %s32_s21 = sshll.u32 %s3830_s20, 4  ;;  %s33_s21 = int_to_ptr.vmem [resolvable:$true] %s32_s21 }
  0x1c   :  { %s3726_s22 = scalar_lea.vmem %s33_s21, 256  ;;  %p3731_p11 = scmp.lt.s32.totalorder %s33_s21, %s33_s21 }
  0x1d   :  { %p3727_p10 = scmp.ne.s32.totalorder %s33_s21, %s3726_s22  ;;  %p3732_p12 = scmp.lt.s32.totalorder %s3726_s22, %s3726_s22 }
  0x1f   :  { %p3733_p13 = por %p3732_p12, %p3731_p11 }
  0x21   :  { %p3734_p0 = pnand %p3733_p13, %p3727_p10 }
  0x23   :  { %3737 = shalt.err (!%p3734_p0)
}
  0x24   :  { %s3831_s3 = smov 128   ;;  %s3832_s23 = smov 8  }
  0x25   :  { %38 = dma.hbm_to_vmem [thread:$0]  %s4580_s2, 256, %s33_s21, [#allocation3], %s3831_s3, %s3831_s3, %s3832_s23  }
  0x26   :  { %s3833_s8 = smov [#allocation7]   ;;  %s3834_s27 = smov [#allocation10]  }
  0x27   :  { %s59_s26 = sshll.u32 %s3833_s8, 4  ;;  %s80_s28 = sshll.u32 %s3834_s27, 4  ;;  %s60_s26 = int_to_ptr.vmem [resolvable:$true] %s59_s26  ;;  %s81_s28 = int_to_ptr.vmem [resolvable:$true] %s80_s28 }
  0x28   :  { %s3746_s29 = scalar_lea.vmem %s60_s26, 16  ;;  %s3750_s30 = scalar_lea.vmem %s60_s26, 32 }
  0x29   :  { %p3747_p1 = scmp.ne.s32.totalorder %s60_s26, %s3746_s29  ;;  %p3751_p2 = scmp.lt.s32.totalorder %s60_s26, %s60_s26 }
  0x2a   :  { %p3752_p3 = scmp.lt.s32.totalorder %s3750_s30, %s3746_s29 }
  0x2c   :  { %p3753_p4 = por %p3752_p3, %p3751_p2 }
  0x2e   :  { %p3754_p5 = pnand %p3753_p4, %p3747_p1 }
  0x30   :  { %3757 = shalt.err (!%p3754_p5)
}
  0x31   :  { %62 = dma.hbm_to_vmem [thread:$0]  %s4584_s6, 16, %s60_s26, [#allocation6]  }
  0x32   :  { %s3766_s16 = scalar_lea.vmem %s81_s28, 512  ;;  %p3771_p7 = scmp.lt.s32.totalorder %s81_s28, %s81_s28 }
  0x33   :  { %p3767_p6 = scmp.ne.s32.totalorder %s81_s28, %s3766_s16  ;;  %p3772_p8 = scmp.lt.s32.totalorder %s3766_s16, %s3766_s16 }
  0x35   :  { %p3773_p9 = por %p3772_p8, %p3771_p7 }
  0x37   :  { %p3774_p10 = pnand %p3773_p9, %p3767_p6 }
  0x39   :  { %3777 = shalt.err (!%p3774_p10)
}
  0x3a   :  { %86 = dma.hbm_to_vmem [thread:$0]  %s4587_s9, 512, %s81_s28, [#allocation9], %s3831_s3, %s3831_s3, %s3832_s23  }
  0x3b   :  { %s3835_s18 = smov [#allocation11]  }
  0x3c   :  { %s95_s19 = sshll.u32 %s3835_s18, 4  ;;  %s96_s19 = int_to_ptr.vmem [resolvable:$true] %s95_s19 }
  0x3d   :  { %s3786_s20 = scalar_lea.vmem %s96_s19, 128  ;;  %p3791_p12 = scmp.lt.s32.totalorder %s96_s19, %s96_s19 }
  0x3e   :  { %p3787_p11 = scmp.ne.s32.totalorder %s96_s19, %s3786_s20  ;;  %p3792_p13 = scmp.lt.s32.totalorder %s3786_s20, %s3786_s20 }
  0x40   :  { %p3793_p0 = por %p3792_p13, %p3791_p12 }
  0x42   :  { %p3794_p1 = pnand %p3793_p0, %p3787_p11 }
  0x44   :  { %3797 = shalt.err (!%p3794_p1)
}
  0x45   :  { %98 = dma.hbm_to_vmem [thread:$0]  %s4589_s11, 128, %s96_s19, [#allocation12]  }
  0x46   :  { %3818 = dma.done.wait [#allocation3], 256  }
  0x47   :  { %3819 = vsyncadd [#allocation3], 4294967040 }
  0x48   :  { %3820 = dma.done.wait [#allocation6], 32  }
  0x49   :  { %3821 = vsyncadd [#allocation6], 4294967264 }
  0x4a   :  { %3822 = dma.done.wait [#allocation9], 528  }
  0x4b   :  { %3823 = vsyncadd [#allocation9], 4294966768 }
  0x4c   :  { %3824 = dma.done.wait [#allocation12], 128  }
  0x4d   :  { %3825 = vsyncadd [#allocation12], 4294967168  ;;  %vm134_vm0 = vcmask 130048   ;;  %v126_v0 = vld [vmem:[#allocation2 + $0x8] sm:$0xff]  ;;  %v125_v1 = vld [vmem:[#allocation2] sm:$0xff]  ;;  %v3836_v11 = vmov 0.0  }
  0x4e   :  { %v119_v2 = vld [vmem:[%s4578_s0] sm:$0xff]  ;;  %3230 = vmatprep.subr.mxu0 %v126_v0  ;;  %v120_v3 = vld [vmem:[%s4578_s0 + $0x8] sm:$0xff]  ;;  %v121_v4 = vld [vmem:[%s4578_s0 + $0x10] sm:$0xff]  ;;  %vm3837_vm1 = vmmov 0   ;;  %vm265_vm2 = vcmask 261120   ;;  %s3839_s27 = smov 64  }
  0x4f   :  { %3234 = vmatprep.mubr.msk.f32.mxu0 %vm134_vm0, %v119_v2  ;;  %3231 = vmatpush3.msra.mxu0 %v126_v0  ;;  %v122_v5 = vld [vmem:[%s4578_s0 + $0x18] sm:$0xff]  ;;  %v123_v7 = vld [vmem:[%s4578_s0 + $0x20] sm:$0xff]  ;;  %v256_v8 = vld [vmem:[%s4582_s4 + $0x10] sm:$0xff]  ;;  %s3840_s18 = smov 96   ;;  %vm588_vm3 = vcmask 597320   ;;  %s3841_s19 = smov 87  }
  0x50   :  { %3232 = vmatprep.subr.mxu0 %v125_v1  ;;  %v257_v6 = vld [vmem:[%s4582_s4 + $0x18] sm:$0xff]  ;;  %v124_v9 = vld [vmem:[%s4578_s0 + $0x28] sm:$0xff]  ;;  %v3984_v13 = vld [vmem:[%s4583_s5 + $0x10] sm:$0xff]  ;;  %s3843_s20 = smov 41   ;;  %s3844_s22 = smov 119   ;;  %vm692_vm4 = vcmask 64512  }
  0x51   :  { %3233 = vmatpush3.msra.mxu0 %v125_v1  ;;  %3243 = vmatprep.subr.mxu1 %v257_v6  ;;  %v3973_v10 = vld [vmem:[%s4583_s5 + $0x18] sm:$0xff]  ;;  %v255_v12 = vld [vmem:[%s4582_s4 + $0x8] sm:$0xff]  ;;  %v254_v14 = vld [vmem:[%s4582_s4] sm:$0xff]  ;;  %vm845_vm5 = vcmask 326656  }
  0x52   :  { %3235 = vmatmul.mubr.msk.f32.vlgmr.msra.gmra.mxu0 %vm134_vm0, %v120_v3  ;;  %3244 = vmatpush3.msra.mxu1 %v257_v6  ;;  %v3994_v15 = vld [vmem:[%s4583_s5 + $0x8] sm:$0xff]  ;;  %v4001_v16 = vld [vmem:[%s4583_s5] sm:$0xff]  ;;  %v3023_v18 = vld [vmem:[#allocation5] ss:$0 sm:$0xff] }
  0x53   :  { %3237 = vmatprep.mubr.msk.f32.mxu0 %vm134_vm0, %v121_v4  ;;  %3245 = vmatprep.subr.mxu1 %v256_v8  ;;  %v4006_v17 = vld [vmem:[%s4579_s1] sm:$0xff]  ;;  %v4028_v40 = vld [vmem:[#allocation7] ss:$0 sm:$0xff]  ;;  %s3838_s1 = smov 32   ;;  %v4036_v52 = vld [vmem:[%s4585_s7 + $0x18] sm:$0xff] }
  0x54   :  { %3260 = vmatprep.subr.mxu0 %v3836_v11  ;;  %3246 = vmatpush3.msra.mxu1 %v256_v8  ;;  %v4041_v53 = vld [vmem:[%s4585_s7 + $0x10] sm:$0xff]  ;;  %v4048_v54 = vld [vmem:[%s4585_s7 + $0x8] sm:$0xff]  ;;  %v4055_v56 = vld [vmem:[%s4585_s7] sm:$0xff] }
  0x55   :  { %3261 = vmatpush3.msra.mxu0 %v3973_v10  ;;  %3247 = vmatprep.subr.mxu1 %v255_v12  ;;  %v4082_v4 = vld [vmem:[#allocation8] ss:$0 sm:$0xff] }
  0x56   :  { %3238 = vmatmul.mubr.msk.f32.gmra.mxu0 %vm134_vm0, %v122_v5  ;;  %3262 = vmatprep.subr.mxu0 %v3836_v11 }
  0x57   :  { %3240 = vmatprep.mubr.msk.f32.mxu0 %vm134_vm0, %v123_v7  ;;  %3248 = vmatpush3.msra.mxu1 %v255_v12  ;;  %v4091_v12 = vld [vmem:[#allocation10 + $0x10] sm:$0xff] }
  0x58   :  { %3263 = vmatpush3.msra.mxu0 %v3984_v13  ;;  %3249 = vmatprep.subr.mxu1 %v254_v14 }
  0x59   :  { %3264 = vmatprep.subr.mxu0 %v3836_v11  ;;  %3250 = vmatpush3.msra.mxu1 %v254_v14  ;;  %v4095_v14 = vld [vmem:[#allocation10 + $0x8] sm:$0xff] }
  0x5a   :  { %3241 = vmatmul.mubr.msk.f32.gmra.mxu0 %vm134_vm0, %v124_v9  ;;  %3271 = vmatprep.subr.mxu1 %v3836_v11  ;;  %v4089_v9 = vld [vmem:[#allocation10 + $0x18] sm:$0xff] }
  0x5b   :  { %3265 = vmatpush3.msra.mxu0 %v3994_v15  ;;  %3268 = vmatprep.mubr.msk.f32.mxu0 %vm3837_vm1, %v3836_v11 }
  0x5c   :  { %3266 = vmatprep.subr.mxu0 %v3836_v11 }
  0x5d   :  { %3267 = vmatpush3.msra.mxu0 %v4001_v16 }
  0x5e   :  { %3269 = vmatmul.mubr.msk.f32.vlgmr.msra.gmra.mxu0 %vm265_vm2, %v4006_v17  ;;  %3282 = vmatprep.subr.mxu0 %v3836_v11 }
  0x5f   :  { %3290 = vmatprep.mubr.msk.f32.mxu0 %vm3837_vm1, %v3836_v11  ;;  %3283 = vmatpush3.msra.mxu0 %v4089_v9 }
  0x60   :  { %3284 = vmatprep.subr.mxu0 %v3836_v11 }
  0x61   :  { %3285 = vmatpush3.msra.mxu0 %v4091_v12 }
  0x62   :  { %3286 = vmatprep.subr.mxu0 %v3836_v11 }
  0x63   :  { %3287 = vmatpush3.msra.mxu0 %v4095_v14 }
  0x64   :  { %3288 = vmatprep.subr.mxu0 %v3836_v11 }
 0x112   :  { %v3236_v19 = vpop.f32.mrf.mxu0 }
 0x113   :  { %v225_v20 = vadd.f32 %v3236_v19, %v3023_v18 }
 0x114   :  { %v219_v21 = vpop.f32.mrf.mxu0 }
 0x115   :  { %v220_v22 = vadd.f32 %v3023_v18, %v219_v21  ;;  %v249_v26 = vmax.f32 %v225_v20, 0.0 }
 0x116   :  { %v3239_v23 = vpop.f32.mrf.mxu0 }
 0x117   :  { %v248_v24 = vmax.f32 %v220_v22, 0.0  ;;  %v235_v25 = vadd.f32 %v3239_v23, %v3023_v18  ;;  %v3842_v23 = vmov 8  }
 0x118   :  { %v229_v27 = vpop.f32.mrf.mxu0  ;;  %3573 = vset.pattern.permute.xlu0 %v3842_v23  ;;  %3574 = vset.pattern.permute.xlu1 %v3842_v23 }
 0x119   :  { %3251 = vmatprep.mubr.msk.f32.mxu1 %vm265_vm2, %v248_v24  ;;  %v230_v28 = vadd.f32 %v3023_v18, %v229_v27  ;;  %v251_v29 = vmax.f32 %v235_v25, 0.0 }
 0x11a   :  { %3252 = vmatmul.mubr.msk.f32.vlgmr.msra.gmra.mxu1 %vm265_vm2, %v249_v26  ;;  %v3242_v31 = vpop.f32.mrf.mxu0 }
 0x11b   :  { %v250_v30 = vmax.f32 %v230_v28, 0.0  ;;  %v245_v32 = vadd.f32 %v3242_v31, %v3023_v18  ;;  %3272 = vmatpush3.msra.mxu1 %v4036_v52 }
 0x11c   :  { %v239_v33 = vpop.f32.mrf.mxu0  ;;  %3273 = vmatprep.subr.mxu1 %v3836_v11 }
 0x11d   :  { %3254 = vmatprep.mubr.msk.f32.mxu1 %vm265_vm2, %v250_v30  ;;  %v240_v34 = vadd.f32 %v3023_v18, %v239_v33  ;;  %v253_v35 = vmax.f32 %v245_v32, 0.0  ;;  %3274 = vmatpush3.msra.mxu1 %v4041_v53 }
 0x11e   :  { %3255 = vmatmul.mubr.msk.f32.gmra.mxu1 %vm265_vm2, %v251_v29  ;;  %v468_v37 = vpop.f32.mrf.mxu0  ;;  %3275 = vmatprep.subr.mxu1 %v3836_v11 }
 0x11f   :  { %v252_v36 = vmax.f32 %v240_v34, 0.0  ;;  %3276 = vmatpush3.msra.mxu1 %v4048_v54 }
 0x120   :  { %v3270_v38 = vpop.f32.mrf.mxu0  ;;  %3277 = vmatprep.subr.mxu1 %v3836_v11 }
 0x121   :  { %3257 = vmatprep.mubr.msk.f32.mxu1 %vm265_vm2, %v252_v36  ;;  %3278 = vmatpush3.msra.mxu1 %v4055_v56  ;;  %v4117_v36 = vld [vmem:[%s4590_s12 + $0x18] sm:$0xff] }
 0x122   :  { %3258 = vmatmul.mubr.msk.f32.gmra.mxu1 %vm265_vm2, %v253_v35  ;;  %3293 = vmatprep.subr.mxu1 %v3836_v11 }
 0x123   :  { %3279 = vmatprep.mubr.msk.f32.mxu1 %vm3837_vm1, %v3836_v11 }
 0x1da   :  { %v4026_v39 = vpop.f32.mrf.mxu1 }
 0x1dc   :  { %v350_v41 = vpop.f32.mrf.mxu1 }
 0x1dd   :  { %v351_v42 = vadd.f32 %v4028_v40, %v350_v41 }
 0x1de   :  { %v4074_v0 = vpop.f32.mrf.mxu1 }
 0x1df   :  { %v472_v43 = vadd.f32 %v468_v37, %v351_v42  ;;  %v4122_v37 = vld [vmem:[%s4590_s12 + $0x10] sm:$0xff]  ;;  %v4132_v42 = vld [vmem:[%s4588_s10] sm:$0xff] }
 0x1e0   :  { %v4076_v1 = vpop.f32.mrf.mxu1 }
 0x1e1   :  { %480 = vrot.lane.b32.xlu0 %v472_v43, %s3838_s1  ;;  %v3038_v44 = vmul.f32 -1.442695, %v472_v43 }
 0x1e2   :  { %v4078_v2 = vpop.f32.mrf.mxu1 }
 0x1e3   :  { %3575 = vpow2.f32 %v3038_v44  ;;  %v4162_v44 = vld [vmem:[%s4590_s12 + $0x8] sm:$0xff] }
 0x1e4   :  { %v4080_v3 = vpop.f32.mrf.mxu1 }
 0x1f0   :  { %v3576_v45 = vpop.eup %3575 }
 0x1f1   :  { %v476_v46 = vadd.f32 1.0, %v3576_v45  ;;  %v4169_v45 = vld [vmem:[%s4590_s12] sm:$0xff] }
 0x1f3   :  { %3577 = vrcp.f32 %v476_v46  ;;  %v4173_v46 = vld [vmem:[#allocation11] sm:$0xff] }
 0x200   :  { %v3578_v47 = vpop.eup %3577 }
 0x201   :  { %v490_v58 = vsub.f32 1.0, %v3578_v47 }
 0x253   :  { %v481_v48 = vpop.permute.xlu0 %480 }
 0x254   :  { %v483_v49 = vmul.f32 %v3578_v47, %v481_v48 }
 0x256   :  { %485 = vrot.lane.b32.xlu0 %v483_v49, %s3839_s27 }
 0x2c8   :  { %v486_v50 = vpop.permute.xlu0 %485 }
 0x2c9   :  { %v488_v51 = vadd.f32 %v486_v50, %v472_v43  ;;  %v356_v50 = vadd.f32 %v4026_v39, %v4028_v40 }
 0x2cb   :  { %3579 = vtanh.f32 %v488_v51 }
 0x2d8   :  { %v3580_v55 = vpop.eup %3579 }
 0x2d9   :  { %492 = vrot.lane.b32.xlu1 %v3580_v55, %s3840_s18 }
 0x2dd   :  { %496 = vrot.lane.b32.xlu1 %v4006_v17, %s3838_s1  ;;  %v4099_v17 = vld [vmem:[#allocation10] sm:$0xff] }
 0x2de   :  { %3289 = vmatpush3.msra.mxu0 %v4099_v17 }
 0x2df   :  { %3298 = vmatprep.subr.mxu0 %v3836_v11 }
 0x34b   :  { %v493_v57 = vpop.permute.xlu1 %492 }
 0x34c   :  { %v495_v60 = vmul.f32 %v493_v57, %v490_v58 }
 0x34f   :  { %v497_v59 = vpop.permute.xlu1 %496 }
 0x350   :  { %v499_v61 = vmul.f32 %v3578_v47, %v497_v59 }
 0x352   :  { %v4064_v62 = vadd.f32 %v499_v61, %v495_v60 }
 0x354   :  { %508 = vrot.lane.b32.xlu0 %v4064_v62, %s3840_s18 }
 0x3c6   :  { %v4068_v63 = vpop.permute.xlu0 %508 }
 0x3c7   :  { %3280 = vmatmul.mubr.msk.f32.vlgmr.msra.gmra.mxu1 %vm265_vm2, %v4068_v63 }
 0x3c8   :  { %3295 = vmatprep.mubr.msk.f32.mxu1 %vm3837_vm1, %v3836_v11 }
 0x487   :  { %v578_v5 = vpop.f32.mrf.mxu1 }
 0x488   :  { %v4085_v6 = vadd.f32 %v4082_v4, %v578_v5 }
 0x489   :  { %v3281_v7 = vpop.f32.mrf.mxu1 }
 0x48a   :  { %v589_v8 = vsel %vm588_vm3, %v4085_v6, -inf  ;;  %v3041_v30 = vmul.f32 -1.442695, %v4085_v6 }
 0x48b   :  { %590 = vmax.xlane.f32.xlu1 %v589_v8 }
 0x514   :  { %v591_v18 = vpop.xlane.xlu1 %590 }
 0x515   :  { %v592_v19 = vsub.f32 %v4085_v6, %v591_v18 }
 0x517   :  { %v593_v20 = vmul.f32 1.442695, %v592_v19 }
 0x519   :  { %3581 = vpow2.f32 %v593_v20 }
 0x526   :  { %v3582_v21 = vpop.eup %3581 }
 0x527   :  { %596 = vrot.lane.b32.xlu0 %v3582_v21, %s3841_s19 }
 0x599   :  { %v597_v22 = vpop.permute.xlu0 %596 }
 0x59a   :  { %3291 = vmatmul.mubr.msk.f32.vlgmr.msra.gmra.mxu0 %vm265_vm2, %v597_v22 }
 0x59b   :  { %3306 = vmatprep.mubr.msk.f32.mxu0 %vm3837_vm1, %v3836_v11  ;;  %3299 = vmatpush3.msra.mxu0 %v4117_v36 }
 0x59c   :  { %3300 = vmatprep.subr.mxu0 %v3836_v11 }
 0x59d   :  { %3301 = vmatpush3.msra.mxu0 %v4122_v37 }
 0x59e   :  { %3302 = vmatprep.subr.mxu0 %v3836_v11 }
 0x59f   :  { %3303 = vmatpush3.msra.mxu0 %v4162_v44 }
 0x5a0   :  { %3304 = vmatprep.subr.mxu0 %v3836_v11 }
 0x5a1   :  { %3305 = vmatpush3.msra.mxu0 %v4169_v45 }
 0x5a2   :  { %3320 = vmatprep.subr.mxu0 %v3836_v11 }
 0x65a   :  { %v666_v24 = vpop.f32.mrf.mxu0 }
 0x65b   :  { %v670_v25 = vmax.f32 %v666_v24, 1e-30 }
 0x65c   :  { %v3292_v26 = vpop.f32.mrf.mxu0 }
 0x65d   :  { %3583 = vrcp.f32 %v670_v25 }
 0x65e   :  { %3585 = vpow2.f32 %v3041_v30 }
 0x66a   :  { %v3584_v27 = vpop.eup %3583 }
 0x66b   :  { %679 = vrot.lane.b32.xlu0 %v3584_v27, %s3843_s20  ;;  %v3586_v31 = vpop.eup %3585 }
 0x66c   :  { %v585_v32 = vadd.f32 1.0, %v3586_v31 }
 0x66e   :  { %3587 = vrcp.f32 %v585_v32 }
 0x66f   :  { %674 = vperm.xlu0 %3573, %v4085_v6  }
 0x67b   :  { %v3588_v34 = vpop.eup %3587 }
 0x6dd   :  { %v680_v28 = vpop.permute.xlu0 %679 }
 0x6de   :  { %v682_v29 = vmul.f32 %v3582_v21, %v680_v28 }
 0x6e0   :  { %684 = vrot.lane.b32.xlu0 %v682_v29, %s3840_s18 }
 0x6ea   :  { %v675_v33 = vpop.permute.xlu0 %674 }
 0x6eb   :  { %v677_v35 = vmul.f32 %v3588_v34, %v675_v33 }
 0x752   :  { %v685_v38 = vpop.permute.xlu0 %684 }
 0x753   :  { %v687_v41 = vmul.f32 %v685_v38, %v677_v35 }
 0x755   :  { %689 = vrot.lane.b32.xlu0 %v687_v41, %s3844_s22 }
 0x7c7   :  { %v690_v43 = vpop.permute.xlu0 %689 }
 0x7c8   :  { %3294 = vmatpush3.msra.mxu1 %v690_v43 }
 0x7c9   :  { %3296 = vmatmul.mubr.msk.f32.vlgmr.msra.gmra.mxu1 %vm692_vm4, %v4132_v42  ;;  %3309 = vmatprep.subr.mxu1 %v3836_v11 }
 0x7ca   :  { %3310 = vmatpush3.msra.mxu1 %v3973_v10  ;;  %3317 = vmatprep.mubr.msk.f32.mxu1 %vm3837_vm1, %v3836_v11 }
 0x7cb   :  { %3311 = vmatprep.subr.mxu1 %v3836_v11 }
 0x7cc   :  { %3312 = vmatpush3.msra.mxu1 %v3984_v13 }
 0x7cd   :  { %3313 = vmatprep.subr.mxu1 %v3836_v11 }
 0x7ce   :  { %3314 = vmatpush3.msra.mxu1 %v3994_v15 }
 0x7cf   :  { %3315 = vmatprep.subr.mxu1 %v3836_v11 }
 0x7d0   :  { %3316 = vmatpush3.msra.mxu1 %v4001_v16 }
 0x7d1   :  { %3318 = vmatmul.mubr.msk.f32.vlgmr.msra.gmra.mxu1 %vm265_vm2, %v4068_v63  ;;  %3331 = vmatprep.subr.mxu1 %v3836_v11 }
 0x7d2   :  { %3332 = vmatpush3.msra.mxu1 %v4089_v9  ;;  %3339 = vmatprep.mubr.msk.f32.mxu1 %vm3837_vm1, %v3836_v11 }
 0x7d3   :  { %3333 = vmatprep.subr.mxu1 %v3836_v11 }
 0x7d4   :  { %3334 = vmatpush3.msra.mxu1 %v4091_v12 }
 0x7d5   :  { %3335 = vmatprep.subr.mxu1 %v3836_v11 }
 0x7d6   :  { %3336 = vmatpush3.msra.mxu1 %v4095_v14 }
 0x7d7   :  { %3337 = vmatprep.subr.mxu1 %v3836_v11 }
 0x7d8   :  { %3338 = vmatpush3.msra.mxu1 %v4099_v17 }
 0x7d9   :  { %3347 = vmatprep.subr.mxu1 %v3836_v11 }
 0x889   :  { %v762_v47 = vpop.f32.mrf.mxu1 }
 0x88a   :  { %v766_v48 = vmul.f32 %v762_v47, %v4173_v46 }
 0x88b   :  { %v3297_v49 = vpop.f32.mrf.mxu1 }
 0x88c   :  { %3307 = vmatmul.mubr.msk.f32.vlgmr.msra.gmra.mxu0 %vm265_vm2, %v766_v48 }
 0x88d   :  { %3321 = vmatpush3.msra.mxu0 %v4036_v52  ;;  %3328 = vmatprep.mubr.msk.f32.mxu0 %vm3837_vm1, %v3836_v11 }
 0x88e   :  { %3322 = vmatprep.subr.mxu0 %v3836_v11 }
 0x88f   :  { %3323 = vmatpush3.msra.mxu0 %v4041_v53 }
 0x890   :  { %3324 = vmatprep.subr.mxu0 %v3836_v11 }
 0x891   :  { %v914_v51 = vpop.f32.mrf.mxu1  ;;  %3325 = vmatpush3.msra.mxu0 %v4048_v54 }
 0x892   :  { %v918_v55 = vadd.f32 %v914_v51, %v356_v50  ;;  %3326 = vmatprep.subr.mxu0 %v3836_v11 }
 0x893   :  { %v3319_v57 = vpop.f32.mrf.mxu1  ;;  %3327 = vmatpush3.msra.mxu0 %v4055_v56 }
 0x894   :  { %926 = vrot.lane.b32.xlu0 %v918_v55, %s3838_s1  ;;  %3342 = vmatprep.subr.mxu0 %v3836_v11  ;;  %v3046_v58 = vmul.f32 -1.442695, %v918_v55 }
 0x896   :  { %3589 = vpow2.f32 %v3046_v58 }
 0x8a3   :  { %v3590_v59 = vpop.eup %3589 }
 0x8a4   :  { %v922_v60 = vadd.f32 1.0, %v3590_v59 }
 0x8a6   :  { %3591 = vrcp.f32 %v922_v60 }
 0x8b3   :  { %v3592_v39 = vpop.eup %3591 }
 0x8b4   :  { %v936_v20 = vsub.f32 1.0, %v3592_v39  ;;  %v942_v22 = vmul.f32 %v3592_v39, %v4064_v62 }
 0x906   :  { %v927_v61 = vpop.permute.xlu0 %926 }
 0x907   :  { %v929_v63 = vmul.f32 %v3592_v39, %v927_v61 }
 0x909   :  { %931 = vrot.lane.b32.xlu0 %v929_v63, %s3839_s27 }
 0x94c   :  { %v4191_v5 = vpop.f32.mrf.mxu0 }
 0x94e   :  { %v3308_v7 = vpop.f32.mrf.mxu0 }
 0x97b   :  { %v932_v8 = vpop.permute.xlu0 %931 }
 0x97c   :  { %v934_v18 = vadd.f32 %v932_v8, %v918_v55  ;;  %v361_v8 = vadd.f32 %v4028_v40, %v4076_v1 }
 0x97e   :  { %3593 = vtanh.f32 %v934_v18 }
 0x98b   :  { %v3594_v19 = vpop.eup %3593 }
 0x98c   :  { %938 = vrot.lane.b32.xlu0 %v3594_v19, %s3840_s18 }
 0x9fe   :  { %v939_v21 = vpop.permute.xlu0 %938 }
 0x9ff   :  { %v941_v23 = vmul.f32 %v939_v21, %v936_v20 }
 0xa01   :  { %v4195_v24 = vadd.f32 %v942_v22, %v941_v23 }
 0xa03   :  { %945 = vrot.lane.b32.xlu1 %v4195_v24, %s3840_s18 }
 0xa75   :  { %v946_v25 = vpop.permute.xlu1 %945 }
 0xa76   :  { %3329 = vmatmul.mubr.msk.f32.vlgmr.msra.gmra.mxu0 %vm265_vm2, %v946_v25 }
 0xa77   :  { %3344 = vmatprep.mubr.msk.f32.mxu0 %vm3837_vm1, %v3836_v11 }
 0xb36   :  { %v1015_v26 = vpop.f32.mrf.mxu0 }
 0xb37   :  { %v4203_v27 = vadd.f32 %v4082_v4, %v1015_v26 }
 0xb38   :  { %v3330_v28 = vpop.f32.mrf.mxu0 }
 0xb39   :  { %v1025_v29 = vsel %vm588_vm3, %v4203_v27, -inf  ;;  %v3048_v49 = vmul.f32 -1.442695, %v4203_v27 }
 0xb3a   :  { %1026 = vmax.xlane.f32.xlu0 %v1025_v29 }
 0xbc3   :  { %v1027_v30 = vpop.xlane.xlu0 %1026 }
 0xbc4   :  { %v1028_v31 = vsub.f32 %v4203_v27, %v1027_v30 }
 0xbc6   :  { %v1029_v32 = vmul.f32 1.442695, %v1028_v31 }
 0xbc8   :  { %3595 = vpow2.f32 %v1029_v32 }
 0xbd5   :  { %v3596_v33 = vpop.eup %3595 }
 0xbd6   :  { %1032 = vrot.lane.b32.xlu1 %v3596_v33, %s3841_s19 }
 0xc48   :  { %v1033_v34 = vpop.permute.xlu1 %1032 }
 0xc49   :  { %3340 = vmatmul.mubr.msk.f32.vlgmr.msra.gmra.mxu1 %vm265_vm2, %v1033_v34 }
 0xc4a   :  { %3348 = vmatpush3.msra.mxu1 %v4117_v36  ;;  %3355 = vmatprep.mubr.msk.f32.mxu1 %vm3837_vm1, %v3836_v11 }
 0xc4b   :  { %3349 = vmatprep.subr.mxu1 %v3836_v11 }
 0xc4c   :  { %3350 = vmatpush3.msra.mxu1 %v4122_v37 }
 0xc4d   :  { %3351 = vmatprep.subr.mxu1 %v3836_v11 }
 0xc4e   :  { %3352 = vmatpush3.msra.mxu1 %v4162_v44 }
 0xc4f   :  { %3353 = vmatprep.subr.mxu1 %v3836_v11 }
 0xc50   :  { %3354 = vmatpush3.msra.mxu1 %v4169_v45 }
 0xc51   :  { %3369 = vmatprep.subr.mxu1 %v3836_v11 }
 0xd09   :  { %v1102_v35 = vpop.f32.mrf.mxu1 }
 0xd0a   :  { %v1106_v38 = vmax.f32 %v1102_v35, 1e-30 }
 0xd0b   :  { %v3341_v41 = vpop.f32.mrf.mxu1 }
 0xd0c   :  { %3597 = vrcp.f32 %v1106_v38 }
 0xd0d   :  { %3599 = vpow2.f32 %v3048_v49 }
 0xd19   :  { %v3598_v43 = vpop.eup %3597 }
 0xd1a   :  { %1115 = vrot.lane.b32.xlu1 %v3598_v43, %s3843_s20  ;;  %v3600_v50 = vpop.eup %3599 }
 0xd1b   :  { %v1022_v51 = vadd.f32 1.0, %v3600_v50 }
 0xd1d   :  { %3601 = vrcp.f32 %v1022_v51 }
 0xd1e   :  { %1110 = vperm.xlu1 %3574, %v4203_v27  }
 0xd2a   :  { %v3602_v57 = vpop.eup %3601 }
 0xd8c   :  { %v1116_v47 = vpop.permute.xlu1 %1115 }
 0xd8d   :  { %v1118_v48 = vmul.f32 %v3596_v33, %v1116_v47 }
 0xd8f   :  { %1120 = vrot.lane.b32.xlu1 %v1118_v48, %s3840_s18 }
 0xd99   :  { %v1111_v55 = vpop.permute.xlu1 %1110 }
 0xd9a   :  { %v1113_v58 = vmul.f32 %v3602_v57, %v1111_v55 }
 0xe01   :  { %v1121_v59 = vpop.permute.xlu1 %1120 }
 0xe02   :  { %v1123_v60 = vmul.f32 %v1121_v59, %v1113_v58 }
 0xe04   :  { %1125 = vrot.lane.b32.xlu1 %v1123_v60, %s3844_s22 }
 0xe76   :  { %v1126_v39 = vpop.permute.xlu1 %1125 }
 0xe77   :  { %3343 = vmatpush3.msra.mxu0 %v1126_v39 }
 0xe78   :  { %3345 = vmatmul.mubr.msk.f32.vlgmr.msra.gmra.mxu0 %vm692_vm4, %v4132_v42  ;;  %3358 = vmatprep.subr.mxu0 %v3836_v11 }
 0xe79   :  { %3359 = vmatpush3.msra.mxu0 %v3973_v10  ;;  %3366 = vmatprep.mubr.msk.f32.mxu0 %vm3837_vm1, %v3836_v11 }
 0xe7a   :  { %3360 = vmatprep.subr.mxu0 %v3836_v11 }
 0xe7b   :  { %3361 = vmatpush3.msra.mxu0 %v3984_v13 }
 0xe7c   :  { %3362 = vmatprep.subr.mxu0 %v3836_v11 }
 0xe7d   :  { %3363 = vmatpush3.msra.mxu0 %v3994_v15 }
 0xe7e   :  { %3364 = vmatprep.subr.mxu0 %v3836_v11 }
 0xe7f   :  { %3365 = vmatpush3.msra.mxu0 %v4001_v16 }
 0xe80   :  { %3367 = vmatmul.mubr.msk.f32.vlgmr.msra.gmra.mxu0 %vm265_vm2, %v946_v25  ;;  %3380 = vmatprep.subr.mxu0 %v3836_v11 }
 0xe81   :  { %3381 = vmatpush3.msra.mxu0 %v4089_v9  ;;  %3388 = vmatprep.mubr.msk.f32.mxu0 %vm3837_vm1, %v3836_v11 }
 0xe82   :  { %3382 = vmatprep.subr.mxu0 %v3836_v11 }
 0xe83   :  { %3383 = vmatpush3.msra.mxu0 %v4091_v12 }
 0xe84   :  { %3384 = vmatprep.subr.mxu0 %v3836_v11 }
 0xe85   :  { %3385 = vmatpush3.msra.mxu0 %v4095_v14 }
 0xe86   :  { %3386 = vmatprep.subr.mxu0 %v3836_v11 }
 0xe87   :  { %3387 = vmatpush3.msra.mxu0 %v4099_v17 }
 0xe88   :  { %3396 = vmatprep.subr.mxu0 %v3836_v11 }
 0xf38   :  { %v1194_v61 = vpop.f32.mrf.mxu0 }
 0xf39   :  { %v1198_v63 = vmul.f32 %v1194_v61, %v4173_v46 }
 0xf3a   :  { %v3346_v7 = vpop.f32.mrf.mxu0 }
 0xf3b   :  { %3356 = vmatmul.mubr.msk.f32.vlgmr.msra.gmra.mxu1 %vm265_vm2, %v1198_v63 }
 0xf3c   :  { %3370 = vmatpush3.msra.mxu1 %v4036_v52  ;;  %3377 = vmatprep.mubr.msk.f32.mxu1 %vm3837_vm1, %v3836_v11 }
 0xf3d   :  { %3371 = vmatprep.subr.mxu1 %v3836_v11 }
 0xf3e   :  { %3372 = vmatpush3.msra.mxu1 %v4041_v53 }
 0xf3f   :  { %3373 = vmatprep.subr.mxu1 %v3836_v11 }
 0xf40   :  { %v1345_v18 = vpop.f32.mrf.mxu0  ;;  %3374 = vmatpush3.msra.mxu1 %v4048_v54 }
 0xf41   :  { %v1349_v19 = vadd.f32 %v1345_v18, %v361_v8  ;;  %3375 = vmatprep.subr.mxu1 %v3836_v11 }
 0xf42   :  { %v3368_v20 = vpop.f32.mrf.mxu0  ;;  %3376 = vmatpush3.msra.mxu1 %v4055_v56 }
 0xf43   :  { %1357 = vrot.lane.b32.xlu0 %v1349_v19, %s3838_s1  ;;  %3391 = vmatprep.subr.mxu1 %v3836_v11  ;;  %v3053_v21 = vmul.f32 -1.442695, %v1349_v19 }
 0xf45   :  { %3603 = vpow2.f32 %v3053_v21 }
 0xf52   :  { %v3604_v22 = vpop.eup %3603 }
 0xf53   :  { %v1353_v23 = vadd.f32 1.0, %v3604_v22 }
 0xf55   :  { %3605 = vrcp.f32 %v1353_v23 }
 0xf62   :  { %v3606_v1 = vpop.eup %3605 }
 0xf63   :  { %v1367_v33 = vsub.f32 1.0, %v3606_v1  ;;  %v1373_v35 = vmul.f32 %v3606_v1, %v4195_v24 }
 0xfb5   :  { %v1358_v25 = vpop.permute.xlu0 %1357 }
 0xfb6   :  { %v1360_v26 = vmul.f32 %v3606_v1, %v1358_v25 }
 0xfb8   :  { %1362 = vrot.lane.b32.xlu1 %v1360_v26, %s3839_s27 }
 0xffb   :  { %v4265_v28 = vpop.f32.mrf.mxu1 }
 0xffd   :  { %v3357_v29 = vpop.f32.mrf.mxu1 }
0x102a   :  { %v1363_v30 = vpop.permute.xlu1 %1362 }
0x102b   :  { %v1365_v31 = vadd.f32 %v1363_v30, %v1349_v19 }
0x102d   :  { %3607 = vtanh.f32 %v1365_v31 }
0x103a   :  { %v3608_v32 = vpop.eup %3607 }
0x103b   :  { %1369 = vrot.lane.b32.xlu1 %v3608_v32, %s3840_s18  ;;  %v366_v32 = vadd.f32 %v4074_v0, %v4028_v40 }
0x10ad   :  { %v1370_v34 = vpop.permute.xlu1 %1369 }
0x10ae   :  { %v1372_v38 = vmul.f32 %v1370_v34, %v1367_v33 }
0x10b0   :  { %v4269_v41 = vadd.f32 %v1373_v35, %v1372_v38 }
0x10b2   :  { %1376 = vrot.lane.b32.xlu1 %v4269_v41, %s3840_s18 }
0x1124   :  { %v1377_v43 = vpop.permute.xlu1 %1376 }
0x1125   :  { %3378 = vmatmul.mubr.msk.f32.vlgmr.msra.gmra.mxu1 %vm265_vm2, %v1377_v43 }
0x1126   :  { %3393 = vmatprep.mubr.msk.f32.mxu1 %vm3837_vm1, %v3836_v11 }
0x11e5   :  { %v1446_v47 = vpop.f32.mrf.mxu1 }
0x11e6   :  { %v4277_v48 = vadd.f32 %v4082_v4, %v1446_v47 }
0x11e7   :  { %v3379_v49 = vpop.f32.mrf.mxu1 }
0x11e8   :  { %v1456_v50 = vsel %vm588_vm3, %v4277_v48, -inf  ;;  %v3055_v18 = vmul.f32 -1.442695, %v4277_v48 }
0x11e9   :  { %1457 = vmax.xlane.f32.xlu1 %v1456_v50 }
0x1272   :  { %v1458_v51 = vpop.xlane.xlu1 %1457 }
0x1273   :  { %v1459_v55 = vsub.f32 %v4277_v48, %v1458_v51 }
0x1275   :  { %v1460_v57 = vmul.f32 1.442695, %v1459_v55 }
0x1277   :  { %3609 = vpow2.f32 %v1460_v57 }
0x1284   :  { %v3610_v58 = vpop.eup %3609 }
0x1285   :  { %1463 = vrot.lane.b32.xlu0 %v3610_v58, %s3841_s19 }
0x12f7   :  { %v1464_v59 = vpop.permute.xlu0 %1463 }
0x12f8   :  { %3389 = vmatmul.mubr.msk.f32.vlgmr.msra.gmra.mxu0 %vm265_vm2, %v1464_v59 }
0x12f9   :  { %3397 = vmatpush3.msra.mxu0 %v4117_v36  ;;  %3404 = vmatprep.mubr.msk.f32.mxu0 %vm3837_vm1, %v3836_v11 }
0x12fa   :  { %3398 = vmatprep.subr.mxu0 %v3836_v11 }
0x12fb   :  { %3399 = vmatpush3.msra.mxu0 %v4122_v37 }
0x12fc   :  { %3400 = vmatprep.subr.mxu0 %v3836_v11 }
0x12fd   :  { %3401 = vmatpush3.msra.mxu0 %v4162_v44 }
0x12fe   :  { %3402 = vmatprep.subr.mxu0 %v3836_v11 }
0x12ff   :  { %3403 = vmatpush3.msra.mxu0 %v4169_v45 }
0x1300   :  { %3418 = vmatprep.subr.mxu0 %v3836_v11 }
0x13b8   :  { %v1533_v60 = vpop.f32.mrf.mxu0 }
0x13b9   :  { %v1537_v39 = vmax.f32 %v1533_v60, 1e-30 }
0x13ba   :  { %v3390_v61 = vpop.f32.mrf.mxu0 }
0x13bb   :  { %3611 = vrcp.f32 %v1537_v39 }
0x13bc   :  { %3613 = vpow2.f32 %v3055_v18 }
0x13c8   :  { %v3612_v63 = vpop.eup %3611 }
0x13c9   :  { %1546 = vrot.lane.b32.xlu0 %v3612_v63, %s3843_s20  ;;  %v3614_v19 = vpop.eup %3613 }
0x13ca   :  { %v1453_v20 = vadd.f32 1.0, %v3614_v19 }
0x13cc   :  { %3615 = vrcp.f32 %v1453_v20 }
0x13cd   :  { %1541 = vperm.xlu0 %3573, %v4277_v48  }
0x13d9   :  { %v3616_v22 = vpop.eup %3615 }
0x143b   :  { %v1547_v7 = vpop.permute.xlu0 %1546 }
0x143c   :  { %v1549_v8 = vmul.f32 %v3610_v58, %v1547_v7 }
0x143e   :  { %1551 = vrot.lane.b32.xlu0 %v1549_v8, %s3840_s18 }
0x1448   :  { %v1542_v21 = vpop.permute.xlu0 %1541 }
0x1449   :  { %v1544_v23 = vmul.f32 %v3616_v22, %v1542_v21 }
0x14b0   :  { %v1552_v1 = vpop.permute.xlu0 %1551 }
0x14b1   :  { %v1554_v25 = vmul.f32 %v1552_v1, %v1544_v23 }
0x14b3   :  { %1556 = vrot.lane.b32.xlu0 %v1554_v25, %s3844_s22 }
0x1525   :  { %v1557_v26 = vpop.permute.xlu0 %1556 }
0x1526   :  { %3392 = vmatpush3.msra.mxu1 %v1557_v26 }
0x1527   :  { %3394 = vmatmul.mubr.msk.f32.vlgmr.msra.gmra.mxu1 %vm692_vm4, %v4132_v42  ;;  %3407 = vmatprep.subr.mxu1 %v3836_v11 }
0x1528   :  { %3408 = vmatpush3.msra.mxu1 %v3973_v10  ;;  %3415 = vmatprep.mubr.msk.f32.mxu1 %vm3837_vm1, %v3836_v11 }
0x1529   :  { %3409 = vmatprep.subr.mxu1 %v3836_v11 }
0x152a   :  { %3410 = vmatpush3.msra.mxu1 %v3984_v13 }
0x152b   :  { %3411 = vmatprep.subr.mxu1 %v3836_v11 }
0x152c   :  { %3412 = vmatpush3.msra.mxu1 %v3994_v15 }
0x152d   :  { %3413 = vmatprep.subr.mxu1 %v3836_v11 }
0x152e   :  { %3414 = vmatpush3.msra.mxu1 %v4001_v16 }
0x152f   :  { %3416 = vmatmul.mubr.msk.f32.vlgmr.msra.gmra.mxu1 %vm265_vm2, %v1377_v43  ;;  %3429 = vmatprep.subr.mxu1 %v3836_v11 }
0x1530   :  { %3430 = vmatpush3.msra.mxu1 %v4089_v9  ;;  %3437 = vmatprep.mubr.msk.f32.mxu1 %vm3837_vm1, %v3836_v11 }
0x1531   :  { %3431 = vmatprep.subr.mxu1 %v3836_v11 }
0x1532   :  { %3432 = vmatpush3.msra.mxu1 %v4091_v12 }
0x1533   :  { %3433 = vmatprep.subr.mxu1 %v3836_v11 }
0x1534   :  { %3434 = vmatpush3.msra.mxu1 %v4095_v14 }
0x1535   :  { %3435 = vmatprep.subr.mxu1 %v3836_v11 }
0x1536   :  { %3436 = vmatpush3.msra.mxu1 %v4099_v17 }
0x1537   :  { %3445 = vmatprep.subr.mxu1 %v3836_v11 }
0x15e7   :  { %v1625_v29 = vpop.f32.mrf.mxu1 }
0x15e8   :  { %v1629_v30 = vmul.f32 %v1625_v29, %v4173_v46 }
0x15e9   :  { %v3395_v31 = vpop.f32.mrf.mxu1 }
0x15ea   :  { %3405 = vmatmul.mubr.msk.f32.vlgmr.msra.gmra.mxu0 %vm265_vm2, %v1629_v30 }
0x15eb   :  { %3419 = vmatpush3.msra.mxu0 %v4036_v52  ;;  %3426 = vmatprep.mubr.msk.f32.mxu0 %vm3837_vm1, %v3836_v11 }
0x15ec   :  { %3420 = vmatprep.subr.mxu0 %v3836_v11 }
0x15ed   :  { %3421 = vmatpush3.msra.mxu0 %v4041_v53 }
0x15ee   :  { %3422 = vmatprep.subr.mxu0 %v3836_v11 }
0x15ef   :  { %v1776_v33 = vpop.f32.mrf.mxu1  ;;  %3423 = vmatpush3.msra.mxu0 %v4048_v54 }
0x15f0   :  { %v1780_v34 = vadd.f32 %v1776_v33, %v366_v32  ;;  %3424 = vmatprep.subr.mxu0 %v3836_v11 }
0x15f1   :  { %v3417_v35 = vpop.f32.mrf.mxu1  ;;  %3425 = vmatpush3.msra.mxu0 %v4055_v56 }
0x15f2   :  { %1788 = vrot.lane.b32.xlu0 %v1780_v34, %s3838_s1  ;;  %3440 = vmatprep.subr.mxu0 %v3836_v11  ;;  %v3060_v38 = vmul.f32 -1.442695, %v1780_v34 }
0x15f4   :  { %3617 = vpow2.f32 %v3060_v38 }
0x1601   :  { %v3618_v43 = vpop.eup %3617 }
0x1602   :  { %v1784_v47 = vadd.f32 1.0, %v3618_v43 }
0x1604   :  { %3619 = vrcp.f32 %v1784_v47 }
0x1611   :  { %v3620_v0 = vpop.eup %3619 }
0x1612   :  { %v1798_v60 = vsub.f32 1.0, %v3620_v0  ;;  %v1804_v61 = vmul.f32 %v3620_v0, %v4269_v41 }
0x1664   :  { %v1789_v49 = vpop.permute.xlu0 %1788 }
0x1665   :  { %v1791_v50 = vmul.f32 %v3620_v0, %v1789_v49 }
0x1667   :  { %1793 = vrot.lane.b32.xlu0 %v1791_v50, %s3839_s27 }
0x16aa   :  { %v4339_v51 = vpop.f32.mrf.mxu0 }
0x16ac   :  { %v3406_v55 = vpop.f32.mrf.mxu0 }
0x16d9   :  { %v1794_v57 = vpop.permute.xlu0 %1793 }
0x16da   :  { %v1796_v58 = vadd.f32 %v1794_v57, %v1780_v34 }
0x16dc   :  { %3621 = vtanh.f32 %v1796_v58 }
0x16e9   :  { %v3622_v59 = vpop.eup %3621 }
0x16ea   :  { %1800 = vrot.lane.b32.xlu0 %v3622_v59, %s3840_s18 }
0x175c   :  { %v1801_v39 = vpop.permute.xlu0 %1800 }
0x175d   :  { %v1803_v63 = vmul.f32 %v1801_v39, %v1798_v60 }
0x175f   :  { %v4343_v7 = vadd.f32 %v1804_v61, %v1803_v63 }
0x1761   :  { %1807 = vrot.lane.b32.xlu1 %v4343_v7, %s3840_s18 }
0x17d3   :  { %v1808_v8 = vpop.permute.xlu1 %1807 }
0x17d4   :  { %3427 = vmatmul.mubr.msk.f32.vlgmr.msra.gmra.mxu0 %vm265_vm2, %v1808_v8 }
0x17d5   :  { %3442 = vmatprep.mubr.msk.f32.mxu0 %vm3837_vm1, %v3836_v11 }
0x1894   :  { %v1877_v18 = vpop.f32.mrf.mxu0 }
0x1895   :  { %v4351_v19 = vadd.f32 %v4082_v4, %v1877_v18 }
0x1896   :  { %v3428_v20 = vpop.f32.mrf.mxu0 }
0x1897   :  { %v1887_v21 = vsel %vm588_vm3, %v4351_v19, -inf  ;;  %v3062_v35 = vmul.f32 -1.442695, %v4351_v19 }
0x1898   :  { %1888 = vmax.xlane.f32.xlu0 %v1887_v21 }
0x1921   :  { %v1889_v22 = vpop.xlane.xlu0 %1888 }
0x1922   :  { %v1890_v23 = vsub.f32 %v4351_v19, %v1889_v22 }
0x1924   :  { %v1891_v1 = vmul.f32 1.442695, %v1890_v23 }
0x1926   :  { %3623 = vpow2.f32 %v1891_v1 }
0x1933   :  { %v3624_v25 = vpop.eup %3623 }
0x1934   :  { %1894 = vrot.lane.b32.xlu1 %v3624_v25, %s3841_s19 }
0x19a6   :  { %v1895_v26 = vpop.permute.xlu1 %1894 }
0x19a7   :  { %3438 = vmatmul.mubr.msk.f32.vlgmr.msra.gmra.mxu1 %vm265_vm2, %v1895_v26 }
0x19a8   :  { %3446 = vmatpush3.msra.mxu1 %v4117_v36  ;;  %3453 = vmatprep.mubr.msk.f32.mxu1 %vm3837_vm1, %v3836_v11 }
0x19a9   :  { %3447 = vmatprep.subr.mxu1 %v3836_v11 }
0x19aa   :  { %3448 = vmatpush3.msra.mxu1 %v4122_v37 }
0x19ab   :  { %3449 = vmatprep.subr.mxu1 %v3836_v11 }
0x19ac   :  { %3450 = vmatpush3.msra.mxu1 %v4162_v44 }
0x19ad   :  { %3451 = vmatprep.subr.mxu1 %v3836_v11 }
0x19ae   :  { %3452 = vmatpush3.msra.mxu1 %v4169_v45 }
0x19af   :  { %3467 = vmatprep.subr.mxu1 %v3836_v11 }
0x1a67   :  { %v1964_v29 = vpop.f32.mrf.mxu1 }
0x1a68   :  { %v1968_v30 = vmax.f32 %v1964_v29, 1e-30 }
0x1a69   :  { %v3439_v31 = vpop.f32.mrf.mxu1 }
0x1a6a   :  { %3625 = vrcp.f32 %v1968_v30 }
0x1a6b   :  { %3627 = vpow2.f32 %v3062_v35 }
0x1a77   :  { %v3626_v32 = vpop.eup %3625 }
0x1a78   :  { %1977 = vrot.lane.b32.xlu1 %v3626_v32, %s3843_s20  ;;  %v3628_v38 = vpop.eup %3627 }
0x1a79   :  { %v1884_v43 = vadd.f32 1.0, %v3628_v38 }
0x1a7b   :  { %3629 = vrcp.f32 %v1884_v43 }
0x1a7c   :  { %1972 = vperm.xlu1 %3574, %v4351_v19  }
0x1a88   :  { %v3630_v0 = vpop.eup %3629 }
0x1aea   :  { %v1978_v33 = vpop.permute.xlu1 %1977 }
0x1aeb   :  { %v1980_v34 = vmul.f32 %v3624_v25, %v1978_v33 }
0x1aed   :  { %1982 = vrot.lane.b32.xlu1 %v1980_v34, %s3840_s18 }
0x1af7   :  { %v1973_v47 = vpop.permute.xlu1 %1972 }
0x1af8   :  { %v1975_v49 = vmul.f32 %v3630_v0, %v1973_v47 }
0x1b5f   :  { %v1983_v50 = vpop.permute.xlu1 %1982 }
0x1b60   :  { %v1985_v55 = vmul.f32 %v1983_v50, %v1975_v49 }
0x1b62   :  { %1987 = vrot.lane.b32.xlu1 %v1985_v55, %s3844_s22 }
0x1bd4   :  { %v1988_v57 = vpop.permute.xlu1 %1987 }
0x1bd5   :  { %3441 = vmatpush3.msra.mxu0 %v1988_v57 }
0x1bd6   :  { %3443 = vmatmul.mubr.msk.f32.vlgmr.msra.gmra.mxu0 %vm692_vm4, %v4132_v42  ;;  %3456 = vmatprep.subr.mxu0 %v3836_v11 }
0x1bd7   :  { %3457 = vmatpush3.msra.mxu0 %v3973_v10  ;;  %3464 = vmatprep.mubr.msk.f32.mxu0 %vm3837_vm1, %v3836_v11 }
0x1bd8   :  { %3458 = vmatprep.subr.mxu0 %v3836_v11 }
0x1bd9   :  { %3459 = vmatpush3.msra.mxu0 %v3984_v13 }
0x1bda   :  { %3460 = vmatprep.subr.mxu0 %v3836_v11 }
0x1bdb   :  { %3461 = vmatpush3.msra.mxu0 %v3994_v15 }
0x1bdc   :  { %3462 = vmatprep.subr.mxu0 %v3836_v11 }
0x1bdd   :  { %3463 = vmatpush3.msra.mxu0 %v4001_v16  ;;  %v371_v16 = vadd.f32 %v4028_v40, %v4080_v3 }
0x1bde   :  { %3465 = vmatmul.mubr.msk.f32.vlgmr.msra.gmra.mxu0 %vm265_vm2, %v1808_v8  ;;  %3478 = vmatprep.subr.mxu0 %v3836_v11 }
0x1bdf   :  { %3479 = vmatpush3.msra.mxu0 %v4089_v9  ;;  %3486 = vmatprep.mubr.msk.f32.mxu0 %vm3837_vm1, %v3836_v11 }
0x1be0   :  { %3480 = vmatprep.subr.mxu0 %v3836_v11 }
0x1be1   :  { %3481 = vmatpush3.msra.mxu0 %v4091_v12 }
0x1be2   :  { %3482 = vmatprep.subr.mxu0 %v3836_v11 }
0x1be3   :  { %3483 = vmatpush3.msra.mxu0 %v4095_v14 }
0x1be4   :  { %3484 = vmatprep.subr.mxu0 %v3836_v11 }
0x1be5   :  { %3485 = vmatpush3.msra.mxu0 %v4099_v17 }
0x1be6   :  { %3494 = vmatprep.subr.mxu0 %v3836_v11 }
0x1c96   :  { %v2056_v10 = vpop.f32.mrf.mxu0 }
0x1c97   :  { %v2060_v13 = vmul.f32 %v2056_v10, %v4173_v46  ;;  %v3659_v10 = vld [vmem:[%s4583_s5 + $0x18] sm:$0xff] }
0x1c98   :  { %v3444_v15 = vpop.f32.mrf.mxu0 }
0x1c99   :  { %3454 = vmatmul.mubr.msk.f32.vlgmr.msra.gmra.mxu1 %vm265_vm2, %v2060_v13  ;;  %v3660_v13 = vld [vmem:[%s4583_s5 + $0x10] sm:$0xff]  ;;  %v3662_v15 = vld [vmem:[%s4583_s5] sm:$0xff] }
0x1c9a   :  { %3468 = vmatpush3.msra.mxu1 %v4036_v52  ;;  %3475 = vmatprep.mubr.msk.f32.mxu1 %vm3837_vm1, %v3836_v11 }
0x1c9b   :  { %3469 = vmatprep.subr.mxu1 %v3836_v11 }
0x1c9c   :  { %3470 = vmatpush3.msra.mxu1 %v4041_v53 }
0x1c9d   :  { %3471 = vmatprep.subr.mxu1 %v3836_v11 }
0x1c9e   :  { %v2207_v9 = vpop.f32.mrf.mxu0  ;;  %3472 = vmatpush3.msra.mxu1 %v4048_v54 }
0x1c9f   :  { %v2211_v12 = vadd.f32 %v2207_v9, %v371_v16  ;;  %3473 = vmatprep.subr.mxu1 %v3836_v11  ;;  %v3663_v16 = vld [vmem:[#allocation10 + $0x18] sm:$0xff]  ;;  %v3664_v9 = vld [vmem:[#allocation10 + $0x10] sm:$0xff] }
0x1ca0   :  { %v3466_v14 = vpop.f32.mrf.mxu0  ;;  %3474 = vmatpush3.msra.mxu1 %v4055_v56 }
0x1ca1   :  { %2219 = vrot.lane.b32.xlu0 %v2211_v12, %s3838_s1  ;;  %3489 = vmatprep.subr.mxu1 %v3836_v11  ;;  %v3067_v52 = vmul.f32 -1.442695, %v2211_v12  ;;  %v3666_v14 = vld [vmem:[#allocation10] sm:$0xff] }
0x1ca3   :  { %3631 = vpow2.f32 %v3067_v52 }
0x1cb0   :  { %v3632_v53 = vpop.eup %3631 }
0x1cb1   :  { %v2215_v17 = vadd.f32 1.0, %v3632_v53 }
0x1cb3   :  { %3633 = vrcp.f32 %v2215_v17 }
0x1cc0   :  { %v3634_v40 = vpop.eup %3633 }
0x1cc1   :  { %v2229_v61 = vsub.f32 1.0, %v3634_v40  ;;  %v2235_v8 = vmul.f32 %v3634_v40, %v4343_v7 }
0x1d13   :  { %v2220_v3 = vpop.permute.xlu0 %2219 }
0x1d14   :  { %v2222_v58 = vmul.f32 %v3634_v40, %v2220_v3  ;;  %v3667_v40 = vld [vmem:[%s4585_s7 + $0x18] sm:$0xff]  ;;  %v3668_v3 = vld [vmem:[%s4585_s7 + $0x10] sm:$0xff] }
0x1d16   :  { %2224 = vrot.lane.b32.xlu1 %v2222_v58, %s3839_s27  ;;  %v3669_v58 = vld [vmem:[#allocation7] ss:$0 sm:$0xff] }
0x1d59   :  { %v4413_v54 = vpop.f32.mrf.mxu1 }
0x1d5b   :  { %v3455_v59 = vpop.f32.mrf.mxu1 }
0x1d88   :  { %v2225_v60 = vpop.permute.xlu1 %2224 }
0x1d89   :  { %v2227_v39 = vadd.f32 %v2225_v60, %v2211_v12  ;;  %v3665_v12 = vld [vmem:[#allocation10 + $0x8] sm:$0xff]  ;;  %v3670_v60 = vld [vmem:[%s4585_s7 + $0x8] sm:$0xff] }
0x1d8b   :  { %3635 = vtanh.f32 %v2227_v39 }
0x1d98   :  { %v3636_v56 = vpop.eup %3635 }
0x1d99   :  { %2231 = vrot.lane.b32.xlu1 %v3636_v56, %s3840_s18 }
0x1e0b   :  { %v2232_v63 = vpop.permute.xlu1 %2231 }
0x1e0c   :  { %v2234_v18 = vmul.f32 %v2232_v63, %v2229_v61  ;;  %v3671_v61 = vld [vmem:[%s4585_s7] sm:$0xff]  ;;  %s3845_s7 = smov 104  }
0x1e0e   :  { %v4417_v20 = vadd.f32 %v2235_v8, %v2234_v18 }
0x1e10   :  { %2238 = vrot.lane.b32.xlu1 %v4417_v20, %s3840_s18 }
0x1e82   :  { %v2239_v21 = vpop.permute.xlu1 %2238 }
0x1e83   :  { %3476 = vmatmul.mubr.msk.f32.vlgmr.msra.gmra.mxu1 %vm265_vm2, %v2239_v21 }
0x1e84   :  { %3491 = vmatprep.mubr.msk.f32.mxu1 %vm3837_vm1, %v3836_v11 }
0x1f43   :  { %v2308_v22 = vpop.f32.mrf.mxu1 }
0x1f44   :  { %v4425_v23 = vadd.f32 %v4082_v4, %v2308_v22 }
0x1f45   :  { %v3477_v1 = vpop.f32.mrf.mxu1 }
0x1f46   :  { %v2318_v25 = vsel %vm588_vm3, %v4425_v23, -inf }
0x1f47   :  { %2319 = vmax.xlane.f32.xlu1 %v2318_v25 }
0x1fd0   :  { %v2320_v26 = vpop.xlane.xlu1 %2319 }
0x1fd1   :  { %v2321_v29 = vsub.f32 %v4425_v23, %v2320_v26 }
0x1fd3   :  { %v2322_v30 = vmul.f32 1.442695, %v2321_v29 }
0x1fd5   :  { %3637 = vpow2.f32 %v2322_v30 }
0x1fe2   :  { %v3638_v31 = vpop.eup %3637 }
0x1fe3   :  { %2325 = vrot.lane.b32.xlu0 %v3638_v31, %s3841_s19 }
0x2055   :  { %v2326_v32 = vpop.permute.xlu0 %2325 }
0x2056   :  { %3487 = vmatmul.mubr.msk.f32.vlgmr.msra.gmra.mxu0 %vm265_vm2, %v2326_v32 }
0x2057   :  { %3495 = vmatpush3.msra.mxu0 %v4117_v36  ;;  %3502 = vmatprep.mubr.msk.f32.mxu0 %vm3837_vm1, %v3836_v11 }
0x2058   :  { %3496 = vmatprep.subr.mxu0 %v3836_v11 }
0x2059   :  { %3497 = vmatpush3.msra.mxu0 %v4122_v37 }
0x205a   :  { %3498 = vmatprep.subr.mxu0 %v3836_v11 }
0x205b   :  { %3499 = vmatpush3.msra.mxu0 %v4162_v44  ;;  %v3069_v44 = vmul.f32 -1.442695, %v4425_v23 }
0x205c   :  { %3500 = vmatprep.subr.mxu0 %v3836_v11 }
0x205d   :  { %3501 = vmatpush3.msra.mxu0 %v4169_v45 }
0x205e   :  { %3516 = vmatprep.subr.mxu0 %v3836_v11 }
0x2116   :  { %v2395_v4 = vpop.f32.mrf.mxu0 }
0x2117   :  { %v2399_v33 = vmax.f32 %v2395_v4, 1e-30 }
0x2118   :  { %v3488_v36 = vpop.f32.mrf.mxu0 }
0x2119   :  { %3639 = vrcp.f32 %v2399_v33 }
0x211a   :  { %3641 = vpow2.f32 %v3069_v44 }
0x2126   :  { %v3640_v34 = vpop.eup %3639 }
0x2127   :  { %2408 = vrot.lane.b32.xlu0 %v3640_v34, %s3843_s20  ;;  %v3642_v38 = vpop.eup %3641 }
0x2128   :  { %v2315_v43 = vadd.f32 1.0, %v3642_v38 }
0x212a   :  { %3643 = vrcp.f32 %v2315_v43 }
0x212b   :  { %2403 = vperm.xlu0 %3573, %v4425_v23  }
0x2137   :  { %v3644_v0 = vpop.eup %3643 }
0x2199   :  { %v2409_v37 = vpop.permute.xlu0 %2408 }
0x219a   :  { %v2411_v35 = vmul.f32 %v3638_v31, %v2409_v37 }
0x219c   :  { %2413 = vrot.lane.b32.xlu0 %v2411_v35, %s3840_s18  ;;  %v3672_v35 = vld [vmem:[#allocation8] ss:$0 sm:$0xff] }
0x21a6   :  { %v2404_v47 = vpop.permute.xlu0 %2403 }
0x21a7   :  { %v2406_v49 = vmul.f32 %v3644_v0, %v2404_v47 }
0x220e   :  { %v2414_v50 = vpop.permute.xlu0 %2413 }
0x220f   :  { %v2416_v55 = vmul.f32 %v2414_v50, %v2406_v49  ;;  %v840_v49 = vadd.f32 %v4191_v5, %v4085_v6  ;;  %v3674_v6 = vld [vmem:[%s4590_s12 + $0x10] sm:$0xff]  ;;  %v3675_v5 = vld [vmem:[%s4590_s12 + $0x8] sm:$0xff] }
0x2211   :  { %2418 = vrot.lane.b32.xlu0 %v2416_v55, %s3844_s22 }
0x2283   :  { %v2419_v57 = vpop.permute.xlu0 %2418 }
0x2284   :  { %3490 = vmatpush3.msra.mxu1 %v2419_v57 }
0x2285   :  { %3492 = vmatmul.mubr.msk.f32.vlgmr.msra.gmra.mxu1 %vm692_vm4, %v4132_v42  ;;  %3505 = vmatprep.subr.mxu1 %v3836_v11  ;;  %v3661_v42 = vld [vmem:[%s4583_s5 + $0x8] sm:$0xff] }
0x2286   :  { %3506 = vmatpush3.msra.mxu1 %v3659_v10  ;;  %3513 = vmatprep.mubr.msk.f32.mxu1 %vm3837_vm1, %v3836_v11 }
0x2287   :  { %3507 = vmatprep.subr.mxu1 %v3836_v11 }
0x2288   :  { %3508 = vmatpush3.msra.mxu1 %v3660_v13 }
0x2289   :  { %3509 = vmatprep.subr.mxu1 %v3836_v11 }
0x228a   :  { %3510 = vmatpush3.msra.mxu1 %v3661_v42 }
0x228b   :  { %3511 = vmatprep.subr.mxu1 %v3836_v11 }
0x228c   :  { %3512 = vmatpush3.msra.mxu1 %v3662_v15 }
0x228d   :  { %3514 = vmatmul.mubr.msk.f32.vlgmr.msra.gmra.mxu1 %vm265_vm2, %v2239_v21  ;;  %3527 = vmatprep.subr.mxu1 %v3836_v11 }
0x228e   :  { %3528 = vmatpush3.msra.mxu1 %v3663_v16  ;;  %3535 = vmatprep.mubr.msk.f32.mxu1 %vm3837_vm1, %v3836_v11 }
0x228f   :  { %3529 = vmatprep.subr.mxu1 %v3836_v11 }
0x2290   :  { %3530 = vmatpush3.msra.mxu1 %v3664_v9 }
0x2291   :  { %3531 = vmatprep.subr.mxu1 %v3836_v11 }
0x2292   :  { %3532 = vmatpush3.msra.mxu1 %v3665_v12 }
0x2293   :  { %3533 = vmatprep.subr.mxu1 %v3836_v11 }
0x2294   :  { %3534 = vmatpush3.msra.mxu1 %v3666_v14 }
0x2295   :  { %3543 = vmatprep.subr.mxu1 %v3836_v11 }
0x2345   :  { %v2487_v52 = vpop.f32.mrf.mxu1 }
0x2346   :  { %v2491_v53 = vmul.f32 %v2487_v52, %v4173_v46  ;;  %v376_v46 = vadd.f32 %v3669_v58, %v4078_v2 }
0x2347   :  { %v3493_v17 = vpop.f32.mrf.mxu1 }
0x2348   :  { %3503 = vmatmul.mubr.msk.f32.vlgmr.msra.gmra.mxu0 %vm265_vm2, %v2491_v53 }
0x2349   :  { %3517 = vmatpush3.msra.mxu0 %v3667_v40  ;;  %3524 = vmatprep.mubr.msk.f32.mxu0 %vm3837_vm1, %v3836_v11 }
0x234a   :  { %3518 = vmatprep.subr.mxu0 %v3836_v11 }
0x234b   :  { %3519 = vmatpush3.msra.mxu0 %v3668_v3 }
0x234c   :  { %3520 = vmatprep.subr.mxu0 %v3836_v11 }
0x234d   :  { %v2638_v59 = vpop.f32.mrf.mxu1  ;;  %3521 = vmatpush3.msra.mxu0 %v3670_v60  ;;  %v3676_v60 = vld [vmem:[%s4588_s10] sm:$0xff]  ;;  %s3846_s10 = smov [#allocation13]  }
0x234e   :  { %v2642_v39 = vadd.f32 %v2638_v59, %v376_v46  ;;  %3522 = vmatprep.subr.mxu0 %v3836_v11 }
0x234f   :  { %v3515_v56 = vpop.f32.mrf.mxu1  ;;  %3523 = vmatpush3.msra.mxu0 %v3671_v61 }
0x2350   :  { %2650 = vrot.lane.b32.xlu0 %v2642_v39, %s3838_s1  ;;  %3538 = vmatprep.subr.mxu0 %v3836_v11  ;;  %v3074_v2 = vmul.f32 -1.442695, %v2642_v39 }
0x2352   :  { %3645 = vpow2.f32 %v3074_v2 }
0x235f   :  { %v3646_v63 = vpop.eup %3645 }
0x2360   :  { %v2646_v8 = vadd.f32 1.0, %v3646_v63  ;;  %v2134_v63 = vadd.f32 %v4413_v54, %v4351_v19 }
0x2362   :  { %3647 = vrcp.f32 %v2646_v8 }
0x236f   :  { %v3648_v18 = vpop.eup %3647 }
0x2370   :  { %v2660_v31 = vsub.f32 1.0, %v3648_v18  ;;  %v2666_v4 = vmul.f32 %v3648_v18, %v4417_v20 }
0x23c2   :  { %v2651_v21 = vpop.permute.xlu0 %2650 }
0x23c3   :  { %v2653_v22 = vmul.f32 %v3648_v18, %v2651_v21 }
0x23c5   :  { %2655 = vrot.lane.b32.xlu0 %v2653_v22, %s3839_s27 }
0x2408   :  { %v4498_v1 = vpop.f32.mrf.mxu0 }
0x2409   :  { %v2565_v18 = vadd.f32 %v4498_v1, %v4425_v23 }
0x240a   :  { %v3504_v25 = vpop.f32.mrf.mxu0 }
0x240b   :  { %v3677_v25 = vld [vmem:[#allocation11] sm:$0xff] }
0x2437   :  { %v2656_v26 = vpop.permute.xlu0 %2655 }
0x2438   :  { %v2658_v29 = vadd.f32 %v2656_v26, %v2642_v39 }
0x243a   :  { %3649 = vtanh.f32 %v2658_v29 }
0x2447   :  { %v3650_v30 = vpop.eup %3649 }
0x2448   :  { %2662 = vrot.lane.b32.xlu0 %v3650_v30, %s3840_s18 }
0x24ba   :  { %v2663_v32 = vpop.permute.xlu0 %2662 }
0x24bb   :  { %v2665_v33 = vmul.f32 %v2663_v32, %v2660_v31 }
0x24bd   :  { %v2667_v36 = vadd.f32 %v2666_v4, %v2665_v33 }
0x24bf   :  { %2669 = vrot.lane.b32.xlu1 %v2667_v36, %s3840_s18 }
0x2531   :  { %v2670_v34 = vpop.permute.xlu1 %2669 }
0x2532   :  { %3525 = vmatmul.mubr.msk.f32.vlgmr.msra.gmra.mxu0 %vm265_vm2, %v2670_v34 }
0x2533   :  { %3540 = vmatprep.mubr.msk.f32.mxu0 %vm3837_vm1, %v3836_v11 }
0x25f2   :  { %v2739_v37 = vpop.f32.mrf.mxu0 }
0x25f3   :  { %v4506_v44 = vadd.f32 %v3672_v35, %v2739_v37 }
0x25f4   :  { %v3526_v38 = vpop.f32.mrf.mxu0 }
0x25f5   :  { %v2749_v43 = vsel %vm588_vm3, %v4506_v44, -inf  ;;  %v3076_v53 = vmul.f32 -1.442695, %v4506_v44 }
0x25f6   :  { %2750 = vmax.xlane.f32.xlu0 %v2749_v43 }
0x260c   :  { %841 = vrot.lane.b32.xlu0 %v4064_v62, %s3845_s7  ;;  %v3673_v62 = vld [vmem:[%s4590_s12 + $0x18] sm:$0xff] }
0x267f   :  { %v2751_v47 = vpop.xlane.xlu0 %2750 }
0x2680   :  { %v2752_v0 = vsub.f32 %v4506_v44, %v2751_v47 }
0x2682   :  { %v2753_v50 = vmul.f32 1.442695, %v2752_v0 }
0x2683   :  { %v842_v55 = vpop.permute.xlu0 %841 }
0x2684   :  { %3651 = vpow2.f32 %v2753_v50  ;;  %v844_v57 = vsel %vm692_vm4, %v840_v49, %v842_v55 }
0x2685   :  { %v846_v10 = vsel %vm845_vm5, %v844_v57, 0.0 }
0x2686   :  { %847 = vst [vmem:[#allocation13] sm:$0xff] %v846_v10 }
0x2691   :  { %v3652_v13 = vpop.eup %3651 }
0x2692   :  { %2756 = vrot.lane.b32.xlu1 %v3652_v13, %s3841_s19 }
0x2704   :  { %v2757_v42 = vpop.permute.xlu1 %2756 }
0x2705   :  { %3536 = vmatmul.mubr.msk.f32.vlgmr.msra.gmra.mxu1 %vm265_vm2, %v2757_v42 }
0x2706   :  { %3544 = vmatpush3.msra.mxu1 %v3673_v62  ;;  %3551 = vmatprep.mubr.msk.f32.mxu1 %vm3837_vm1, %v3836_v11 }
0x2707   :  { %3545 = vmatprep.subr.mxu1 %v3836_v11 }
0x2708   :  { %3546 = vmatpush3.msra.mxu1 %v3674_v6 }
0x2709   :  { %3547 = vmatprep.subr.mxu1 %v3836_v11 }
0x270a   :  { %3548 = vmatpush3.msra.mxu1 %v3675_v5 }
0x270b   :  { %3549 = vmatprep.subr.mxu1 %v3836_v11 }
0x270c   :  { %3550 = vmatpush3.msra.mxu1 %v4169_v45 }
0x27c5   :  { %v2826_v15 = vpop.f32.mrf.mxu1 }
0x27c6   :  { %v2830_v16 = vmax.f32 %v2826_v15, 1e-30 }
0x27c7   :  { %v3537_v9 = vpop.f32.mrf.mxu1 }
0x27c8   :  { %3653 = vrcp.f32 %v2830_v16 }
0x27c9   :  { %3655 = vpow2.f32 %v3076_v53 }
0x27d5   :  { %v3654_v12 = vpop.eup %3653 }
0x27d6   :  { %2839 = vrot.lane.b32.xlu1 %v3654_v12, %s3843_s20  ;;  %v3656_v17 = vpop.eup %3655  ;;  %s3008_s20 = sshll.u32 %s3846_s10, 4  ;;  %s3009_s20 = int_to_ptr.vmem [resolvable:$true] %s3008_s20 }
0x27d7   :  { %v2746_v11 = vadd.f32 1.0, %v3656_v17  ;;  %p3803_p3 = scmp.lt.s32.totalorder %s3009_s20, %s3009_s20 }
0x27d9   :  { %3657 = vrcp.f32 %v2746_v11 }
0x27da   :  { %2834 = vperm.xlu1 %3574, %v4506_v44  }
0x27e6   :  { %v3658_v40 = vpop.eup %3657 }
0x2848   :  { %v2840_v14 = vpop.permute.xlu1 %2839 }
0x2849   :  { %v2842_v52 = vmul.f32 %v3652_v13, %v2840_v14 }
0x284b   :  { %2844 = vrot.lane.b32.xlu1 %v2842_v52, %s3840_s18 }
0x2855   :  { %v2835_v45 = vpop.permute.xlu1 %2834 }
0x2856   :  { %v2837_v3 = vmul.f32 %v3658_v40, %v2835_v45 }
0x28bd   :  { %v2845_v58 = vpop.permute.xlu1 %2844 }
0x28be   :  { %v2847_v46 = vmul.f32 %v2845_v58, %v2837_v3 }
0x28c0   :  { %2849 = vrot.lane.b32.xlu1 %v2847_v46, %s3844_s22  ;;  %s3798_s22 = scalar_lea.vmem %s3009_s20, 768 }
0x28c1   :  { %p3799_p2 = scmp.ne.s32.totalorder %s3009_s20, %s3798_s22  ;;  %p3804_p4 = scmp.lt.s32.totalorder %s3798_s22, %s3798_s22 }
0x28c3   :  { %p3805_p5 = por %p3804_p4, %p3803_p3 }
0x28c4   :  { %1273 = vrot.lane.b32.xlu1 %v4195_v24, %s3845_s7  ;;  %v1272_v24 = vadd.f32 %v4265_v28, %v4203_v27 }
0x28c5   :  { %p3806_p6 = pnand %p3805_p5, %p3799_p2 }
0x28c8   :  { %1704 = vrot.lane.b32.xlu1 %v4269_v41, %s3845_s7 }
0x28cc   :  { %2135 = vrot.lane.b32.xlu1 %v4343_v7, %s3845_s7 }
0x28d0   :  { %2566 = vrot.lane.b32.xlu1 %v4417_v20, %s3845_s7  ;;  %v1703_v20 = vadd.f32 %v4339_v51, %v4277_v48 }
0x28d4   :  { %2997 = vrot.lane.b32.xlu1 %v2667_v36, %s3845_s7 }
0x2932   :  { %v2850_v59 = vpop.permute.xlu1 %2849 }
0x2933   :  { %3539 = vmatpush3.msra.mxu0 %v2850_v59 }
0x2934   :  { %3541 = vmatmul.mubr.msk.f32.vlgmr.msra.gmra.mxu0 %vm692_vm4, %v3676_v60 }
0x2936   :  { %v1274_v41 = vpop.permute.xlu1 %1273 }
0x2937   :  { %v1276_v39 = vsel %vm692_vm4, %v1272_v24, %v1274_v41 }
0x2938   :  { %v1277_v7 = vsel %vm845_vm5, %v1276_v39, 0.0 }
0x2939   :  { %1278 = vst [vmem:[#allocation13 + $0x8] sm:$0xff] %v1277_v7 }
0x293a   :  { %v1705_v56 = vpop.permute.xlu1 %1704 }
0x293b   :  { %v1707_v61 = vsel %vm692_vm4, %v1703_v20, %v1705_v56 }
0x293c   :  { %v1708_v2 = vsel %vm845_vm5, %v1707_v61, 0.0 }
0x293d   :  { %1709 = vst [vmem:[#allocation13 + $0x10] sm:$0xff] %v1708_v2 }
0x293e   :  { %v2136_v8 = vpop.permute.xlu1 %2135 }
0x293f   :  { %v2138_v27 = vsel %vm692_vm4, %v2134_v63, %v2136_v8 }
0x2940   :  { %v2139_v28 = vsel %vm845_vm5, %v2138_v27, 0.0 }
0x2941   :  { %2140 = vst [vmem:[#allocation13 + $0x18] sm:$0xff] %v2139_v28 }
0x2942   :  { %v2567_v48 = vpop.permute.xlu1 %2566 }
0x2943   :  { %v2569_v51 = vsel %vm692_vm4, %v2565_v18, %v2567_v48 }
0x2944   :  { %v2570_v21 = vsel %vm845_vm5, %v2569_v51, 0.0 }
0x2945   :  { %2571 = vst [vmem:[#allocation13 + $0x20] sm:$0xff] %v2570_v21 }
0x2946   :  { %v2998_v30 = vpop.permute.xlu1 %2997 }
0x29f4   :  { %v2918_v22 = vpop.f32.mrf.mxu0 }
0x29f5   :  { %v2922_v26 = vmul.f32 %v3677_v25, %v2918_v22 }
0x29f6   :  { %v3542_v19 = vpop.f32.mrf.mxu0 }
0x29f7   :  { %3552 = vmatmul.mubr.msk.f32.vlgmr.msra.gmra.mxu1 %vm265_vm2, %v2922_v26 }
0x2ab7   :  { %v2992_v54 = vpop.f32.mrf.mxu1 }
0x2ab8   :  { %v2996_v29 = vadd.f32 %v2992_v54, %v4506_v44 }
0x2ab9   :  { %v3553_v23 = vpop.f32.mrf.mxu1 }
0x2aba   :  { %v3000_v1 = vsel %vm692_vm4, %v2996_v29, %v2998_v30 }
0x2abb   :  { %v3001_v31 = vsel %vm845_vm5, %v3000_v1, 0.0 }
0x2abc   :  { %3002 = vst [vmem:[#allocation13 + $0x28] sm:$0xff] %v3001_v31 }
0x2abd   :  { %3809 = shalt.err (!%p3806_p6)
}
0x2abe   :  { %3014 = dma.vmem_to_hbm [thread:$0]  %s3009_s20, 768, %s4591_s13, [#allocation4], %s3831_s3, %s3831_s3, %s3832_s23  }
0x2abf   :  { %3826 = dma.done.wait [#allocation4], 768  }
0x2ac0   :  { %3827 = vsyncadd [#allocation4], 4294966528 }
0x2ac1   :  { %3018 = vsyncpa [#allocation3], 1 }
0x2ac2   :  { %3019 = vsyncpa [#allocation6], 1 }
0x2ac3   :  { %3020 = vsyncpa [#allocation9], 1 }
0x2ac4   :  { %3021 = vsyncpa [#allocation12], 1 }
0x2ac5   :  { %3022 = vsyncpa [#allocation4], 1 }

</bundles_post_ra>
